<compile_context>
chip_gen: v7x
topology: tpu7x:2x2x1
jax: 0.10.0
libtpu: 0.0.40
codegen_flags: <defaults>
</compile_context>

<pallas_src>
import functools

import jax
import jax.numpy as jnp
import numpy as np
from jax import lax
from jax.experimental import pallas as pl
from jax.experimental.pallas import tpu as pltpu

_VMEM_LIMIT_BYTES = 64 * 1024 * 1024


# ----------------------------------------------------------------------------
# Linear projection kernel (M-tiled, weight resident)
# ----------------------------------------------------------------------------
def _linear_kernel(x_ref, w_ref, b_ref, o_ref):
    # x: (bm, K), w: (K, N), b: (1, N)  ->  o: (bm, N)
    o_ref[...] = (
        jnp.dot(x_ref[...], w_ref[...], preferred_element_type=jnp.float32)
        + b_ref[...]
    ).astype(o_ref.dtype)


def pallas_linear(x2d, w_kn, b, *, block_m=512):
    """y = x2d @ w_kn + b.  x2d: (M, K), w_kn: (K, N) (pre-transposed), b: (N,)."""
    M, K = x2d.shape
    N = w_kn.shape[1]
    bm = min(block_m, M)
    grid = (pl.cdiv(M, bm),)
    return pl.pallas_call(
        _linear_kernel,
        out_shape=jax.ShapeDtypeStruct((M, N), x2d.dtype),
        grid=grid,
        in_specs=[
            pl.BlockSpec((bm, K), lambda i: (i, 0)),
            pl.BlockSpec((K, N), lambda i: (0, 0)),   # resident across steps
            pl.BlockSpec((1, N), lambda i: (0, 0)),   # resident across steps
        ],
        out_specs=pl.BlockSpec((bm, N), lambda i: (i, 0)),
        compiler_params=pltpu.CompilerParams(
            dimension_semantics=("parallel",),
            vmem_limit_bytes=_VMEM_LIMIT_BYTES),
    )(x2d, w_kn, b.reshape(1, N))


# ----------------------------------------------------------------------------
# rel_shift: strided-roll fast path with one-off hardware calibration + fallback
# ----------------------------------------------------------------------------
_REL_SHIFT_MODE_CACHE = {}


def _rel_shift_mode(L, P):
    """Pick a rel_shift implementation.

    Returns ("roll", shift, stride) if a single strided pltpu.roll reproduces the
    Transformer-XL rel-shift (validated on-device against numpy), else ("log2",).
    """
    key = (int(L), int(P))
    if key in _REL_SHIFT_MODE_CACHE:
        return _REL_SHIFT_MODE_CACHE[key]

    x = np.arange(L * P, dtype=np.float32).reshape(L, P)
    want = np.stack([x[i, L - 1 - i: 2 * L - 1 - i] for i in range(L)])  # (L, L)

    mode = ("log2",)
    # Two candidate sign conventions for "row i left-rotated by (L-1-i)".
    for shift, stride in ((L % P, 1), ((L - 1) % P, -1)):
        try:
            def _cal_kernel(x_ref, o_ref, *, _shift=shift, _stride=stride):
                rolled = pltpu.roll(x_ref[...], shift=_shift, axis=1,
                                    stride=_stride, stride_axis=0)
                o_ref[...] = rolled[:, :L]

            got = pl.pallas_call(
                _cal_kernel,
                out_shape=jax.ShapeDtypeStruct((L, L), jnp.float32),
            )(jnp.asarray(x))
            got = np.asarray(jax.block_until_ready(got))
            if np.array_equal(got, want):
                mode = ("roll", int(shift), int(stride))
                break
        except Exception:
            # unsupported stride sign / lowering failure -> try next / fall back
            pass

    _REL_SHIFT_MODE_CACHE[key] = mode
    return mode


def _rel_shift(bd_full, L, mode):
    """(L, 2L-1) -> (L, L): out[i, j] = bd_full[i, L-1-i+j]."""
    if mode[0] == "roll":
        _, shift, stride = mode
        rolled = pltpu.roll(bd_full, shift=shift, axis=1,
                            stride=stride, stride_axis=0)
        return rolled[:, :L]
    # Fallback: ceil(log2(L)) conditional uniform lane rotations (binary decomposition
    # of the per-row shift); only slice/concat/iota/where -> always lowers.
    row = lax.broadcasted_iota(jnp.int32, (L, 1), 0)
    shift_amt = (L - 1) - row                                  # (L, 1), in [0, L-1]
    nbits = max(1, (L - 1).bit_length())
    x = bd_full
    for bit in range(nbits):
        k_rot = 1 << bit
        rot = jnp.concatenate([x[:, k_rot:], x[:, :k_rot]], axis=1)
        x = jnp.where((shift_amt & k_rot) != 0, rot, x)
    return x[:, :L]


# ----------------------------------------------------------------------------
# Fused rel-pos attention kernel: one grid step per (batch, head)
# ----------------------------------------------------------------------------
def _rel_attn_head_kernel(q_ref, k_ref, v_ref, p_ref, bu_ref, bv_ref, o_ref,
                          *, scaling, mm_dtype, approx_recip, rel_shift_mode):
    # q/k/v: (1, 1, L, D)   p: (1, P, D)   bu/bv: (1, 1, D)   o: (1, 1, L, D)
    L = q_ref.shape[2]

    q = q_ref[0, 0].astype(jnp.float32) * scaling               # (L, D) f32
    k = k_ref[0, 0]                                              # (L, D)
    v = v_ref[0, 0]                                              # (L, D)
    p = p_ref[0]                                                 # (P, D)
    bu = bu_ref[0].astype(jnp.float32)                           # (1, D)
    bv = bv_ref[0].astype(jnp.float32)                           # (1, D)

    # Fused score matmul: one (L, L+P) MXU launch + a tiny (2, L+P) bias-row matmul.
    kp = jnp.concatenate([k, p], axis=0).astype(mm_dtype)        # (L+P, D)
    biases = jnp.concatenate([bu, bv], axis=0).astype(mm_dtype)  # (2, D)

    nt = (((1,), (1,)), ((), ()))                                # A @ B^T (contract D)
    s = lax.dot_general(q.astype(mm_dtype), kp, nt,
                        preferred_element_type=jnp.float32)      # (L, L+P)
    br = lax.dot_general(biases, kp, nt,
                         preferred_element_type=jnp.float32)     # (2, L+P)

    ac = s[:, :L] + br[0:1, :L]                                  # (L, L)
    bd_full = s[:, L:] + br[1:2, L:]                             # (L, P)
    bd = _rel_shift(bd_full, L, rel_shift_mode)                  # (L, L)

    logits = ac + bd
    m = jnp.max(logits, axis=-1, keepdims=True)
    e = jnp.exp(logits - m)
    denom = jnp.sum(e, axis=-1, keepdims=True)
    probs = e * pl.reciprocal(denom, approx=approx_recip)        # EUP reciprocal

    out = jnp.dot(probs.astype(mm_dtype), v.astype(mm_dtype),
                  preferred_element_type=jnp.float32)            # (L, D)
    o_ref[0, 0] = out.astype(o_ref.dtype)


def pallas_rel_attention(q, k, v, p, bias_u, bias_v, *, scaling, precise):
    """q/k/v: (N, H, L, D), p: (H, 2L-1, D), bias_u/bias_v: (H, D) -> (N, H, L, D)."""
    N, H, L, D = q.shape
    P = p.shape[1]
    assert P == 2 * L - 1, f"pos length {P} != 2*L-1 (left_context>0 unsupported)"

    mm_dtype = jnp.float32 if precise else jnp.bfloat16
    mode = _rel_shift_mode(L, P)

    kernel = functools.partial(
        _rel_attn_head_kernel, scaling=scaling, mm_dtype=mm_dtype,
        approx_recip=not precise, rel_shift_mode=mode)

    head_spec = pl.BlockSpec((1, 1, L, D), lambda b, h: (b, h, 0, 0))
    bias_spec = pl.BlockSpec((1, 1, D), lambda b, h: (h, 0, 0))

    return pl.pallas_call(
        kernel,
        out_shape=jax.ShapeDtypeStruct((N, H, L, D), q.dtype),
        grid=(N, H),
        in_specs=[
            head_spec, head_spec, head_spec,
            pl.BlockSpec((1, P, D), lambda b, h: (h, 0, 0)),
            bias_spec, bias_spec,
        ],
        out_specs=head_spec,
        compiler_params=pltpu.CompilerParams(
            dimension_semantics=("parallel", "parallel"),
            vmem_limit_bytes=_VMEM_LIMIT_BYTES),
    )(q, k, v, p, bias_u.reshape(H, 1, D), bias_v.reshape(H, 1, D))


# ----------------------------------------------------------------------------
# Parameter packing (done once): pre-transposed weights (PyTorch (out,in) -> (in,out))
# ----------------------------------------------------------------------------
def pack_params(params):
    E = params["in_proj_w"].shape[1]
    dtype = params["in_proj_w"].dtype
    return {
        "in_proj_w_kn": jnp.asarray(params["in_proj_w"].T),    # (E, 3E)
        "in_proj_b": params["in_proj_b"],
        "pos_w_kn": jnp.asarray(params["pos_w"].T),            # (E, E)
        "pos_b": jnp.zeros((E,), dtype),                       # linear_pos has no bias
        "out_proj_w_kn": jnp.asarray(params["out_proj_w"].T),  # (E, E)
        "out_proj_b": params["out_proj_b"],
        "pos_bias_u": params["pos_bias_u"],
        "pos_bias_v": params["pos_bias_v"],
        "pos_bias_u_scale": params["pos_bias_u_scale"],
        "pos_bias_v_scale": params["pos_bias_v_scale"],
    }


# ----------------------------------------------------------------------------
# Module forward (glue in plain JAX, hot paths in Pallas)
# ----------------------------------------------------------------------------
def rel_pos_mha_forward(query, pos_emb, packed, num_heads, precise=False):
    """Self-attention path of RelPositionMultiheadAttention.

    query: (L, N, E), pos_emb: (1, 2L-1, E) -> attn_output: (L, N, E)
    """
    L, N, E = query.shape
    H = num_heads
    D = E // H
    scaling = float(D) ** -0.5
    assert pos_emb.shape[0] == 1, "only pos_emb batch == 1 supported"
    P = pos_emb.shape[1]

    # Time-major -> batch-major once, for clean per-(batch, head) blocks.
    q_nle = jnp.transpose(query, (1, 0, 2))                       # (N, L, E)

    # in_proj (effective ScaledLinear weight/bias): (N*L, E) -> (N*L, 3E)
    qkv = pallas_linear(
        q_nle.reshape(N * L, E), packed["in_proj_w_kn"], packed["in_proj_b"]
    ).reshape(N, L, 3, H, D)
    qkv = jnp.transpose(qkv, (2, 0, 3, 1, 4))                     # (3, N, H, L, D)
    q, k, v = qkv[0], qkv[1], qkv[2]

    # linear_pos (no bias): (2L-1, E) -> (2L-1, E) -> (H, 2L-1, D)
    p2d = pallas_linear(pos_emb.reshape(P, E), packed["pos_w_kn"], packed["pos_b"])
    p = jnp.transpose(p2d.reshape(P, H, D), (1, 0, 2))            # (H, P, D)

    bias_u = packed["pos_bias_u"] * jnp.exp(packed["pos_bias_u_scale"])   # (H, D)
    bias_v = packed["pos_bias_v"] * jnp.exp(packed["pos_bias_v_scale"])   # (H, D)

    # fused rel-pos attention (scale + bias rows + rel-shift + softmax + PV in-kernel)
    attn = pallas_rel_attention(
        q, k, v, p, bias_u, bias_v, scaling=scaling, precise=precise
    )                                                              # (N, H, L, D)

    # (N, H, L, D) -> (L, N, H*D) == (L, N, E); out_proj; need_weights=False.
    attn = jnp.transpose(attn, (2, 0, 1, 3)).reshape(L * N, E)
    out = pallas_linear(attn, packed["out_proj_w_kn"], packed["out_proj_b"])
    return out.reshape(L, N, E)


# ----------------------------------------------------------------------------
# Pure-JAX reference (PyTorch-orientation params) for correctness check
# ----------------------------------------------------------------------------
def rel_pos_mha_reference(query, pos_emb, params, num_heads):
    L, N, E = query.shape
    H = num_heads
    D = E // H
    scaling = float(D) ** -0.5

    qkv = query @ params["in_proj_w"].T + params["in_proj_b"]
    q, k, v = qkv[..., :E], qkv[..., E:2 * E], qkv[..., 2 * E:]

    P = pos_emb.shape[1]
    p = (pos_emb @ params["pos_w"].T).reshape(1, P, H, D).transpose(0, 2, 3, 1)  # (1,H,D,2L-1)

    q = (q * scaling).reshape(L, N, H, D).transpose(1, 0, 2, 3)
    bias_u = params["pos_bias_u"] * jnp.exp(params["pos_bias_u_scale"])
    bias_v = params["pos_bias_v"] * jnp.exp(params["pos_bias_v_scale"])
    q_u = (q + bias_u).transpose(0, 2, 1, 3)                     # (N,H,L,D)
    q_v = (q + bias_v).transpose(0, 2, 1, 3)
    k_t = k.reshape(L, N, H, D).transpose(1, 2, 3, 0)            # (N,H,D,S)
    v_b = v.reshape(L, N, H, D).transpose(1, 2, 0, 3)            # (N,H,S,D)

    ac = q_u @ k_t                                               # (N,H,L,S)
    bd_full = q_v @ p                                            # (N,H,L,2L-1)
    idx = (L - 1) - jnp.arange(L)[:, None] + jnp.arange(L)[None, :]
    idx = jnp.broadcast_to(idx, bd_full.shape[:2] + (L, L))
    bd = jnp.take_along_axis(bd_full, idx, axis=-1)              # (N,H,L,L)

    w = jax.nn.softmax(ac + bd, axis=-1)
    attn = w @ v_b                                               # (N,H,L,D)
    attn = attn.transpose(2, 0, 1, 3).reshape(L, N, E)
    return attn @ params["out_proj_w"].T + params["out_proj_b"]


# ----------------------------------------------------------------------------
if __name__ == "__main__":
    # Small shapes: L=8 (target/source seq), N=2 (batch), E=32, H=4, D=8
    L, N, E, H = 8, 2, 32, 4
    dtype = jnp.float32

    key = jax.random.PRNGKey(0)
    ks = jax.random.split(key, 10)

    params = {
        "in_proj_w": 0.1 * jax.random.normal(ks[0], (3 * E, E), dtype),
        "in_proj_b": 0.1 * jax.random.normal(ks[1], (3 * E,), dtype),
        "out_proj_w": 0.1 * jax.random.normal(ks[2], (E, E), dtype),
        "out_proj_b": 0.1 * jax.random.normal(ks[3], (E,), dtype),
        "pos_w": 0.1 * jax.random.normal(ks[4], (E, E), dtype),
        "pos_bias_u": 0.01 * jax.random.normal(ks[5], (H, E // H), dtype),
        "pos_bias_v": 0.01 * jax.random.normal(ks[6], (H, E // H), dtype),
        "pos_bias_u_scale": jnp.zeros((), dtype),
        "pos_bias_v_scale": jnp.zeros((), dtype),
    }

    query = jax.random.normal(ks[7], (L, N, E), dtype)            # (L, N, E)
    pos_emb = jax.random.normal(ks[8], (1, 2 * L - 1, E), dtype)  # (1, 2L-1, E)

    packed = pack_params(params)                                  # pre-transposed weights (once)

    # Pre-warm the rel_shift calibration (tiny one-off pallas_call) outside jit tracing.
    _rel_shift_mode(L, 2 * L - 1)

    fwd = jax.jit(rel_pos_mha_forward, static_argnames=("num_heads", "precise"))
    ref = rel_pos_mha_reference(query, pos_emb, params, H)

    # 1) precise path: f32 MXU + exact reciprocal -> strict check vs reference.
    out_precise = jax.block_until_ready(
        fwd(query, pos_emb, packed, num_heads=H, precise=True))
    np.testing.assert_allclose(np.asarray(out_precise), np.asarray(ref),
                               rtol=1e-4, atol=1e-4)

    # 2) fast path (default): bf16 MXU operands + approx reciprocal -> loose check.
    out_fast = jax.block_until_ready(
        fwd(query, pos_emb, packed, num_heads=H, precise=False))
    np.testing.assert_allclose(np.asarray(out_fast), np.asarray(ref),
                               rtol=2e-2, atol=2e-2)

    print("KERNEL_OK")
</pallas_src>

<mosaic_0001>
module attributes {stable_mosaic.version = 11 : i64} {
  func.func @_cal_kernel(%arg0: memref<8x15xf32, #tpu.memory_space<vmem>>, %arg1: memref<8x8xf32, #tpu.memory_space<vmem>>) attributes {dimension_semantics = [], scalar_prefetch = 0 : i64, scratch_operands = 0 : i64, tpu.core_type = #tpu.core_type<tc>} {
    %c0 = arith.constant 0 : index
    %c0_0 = arith.constant 0 : index
    %0 = vector.load %arg0[%c0, %c0_0] : memref<8x15xf32, #tpu.memory_space<vmem>>, vector<8x15xf32>
    %c8_i32 = arith.constant 8 : i32
    %1 = tpu.dynamic_rotate %0 by %c8_i32 dim 1 {stride = 1 : si32, stride_dimension = 0 : si32} : vector<8x15xf32>, i32 -> vector<8x15xf32>
    %2 = vector.extract_strided_slice %1 {offsets = [0, 0], sizes = [8, 8], strides = [1, 1]} : vector<8x15xf32> to vector<8x8xf32>
    %c0_1 = arith.constant 0 : index
    %c0_2 = arith.constant 0 : index
    %3 = vector.load %arg1[%c0_1, %c0_2] : memref<8x8xf32, #tpu.memory_space<vmem>>, vector<8x8xf32>
    tpu.vector_store %arg1[%c0_1, %c0_2], %2 {strides = array<i32>} : memref<8x8xf32, #tpu.memory_space<vmem>>, vector<8x8xf32>,
    return
  }
}

module attributes {stable_mosaic.version = 11 : i64} {
  func.func @_linear_kernel(%arg0: i32, %arg1: memref<15x32xf32, #tpu.memory_space<vmem>>, %arg2: memref<32x32xf32, #tpu.memory_space<vmem>>, %arg3: memref<1x32xf32, #tpu.memory_space<vmem>>, %arg4: memref<15x32xf32, #tpu.memory_space<vmem>>) attributes {dimension_semantics = [#tpu.dimension_semantics<parallel>], iteration_bounds = array<i64: 1>, scalar_prefetch = 0 : i64, scratch_operands = 0 : i64, tpu.core_type = #tpu.core_type<tc>, window_params = [{transform_indices = @transform_0, window_bounds = array<i64: 15, 32>}, {pipeline_mode = #tpu.pipeline_mode<synchronous>, transform_indices = @transform_1, window_bounds = array<i64: 32, 32>}, {pipeline_mode = #tpu.pipeline_mode<synchronous>, transform_indices = @transform_2, window_bounds = array<i64: 1, 32>}, {transform_indices = @transform_3, window_bounds = array<i64: 15, 32>}]} {
    %c0 = arith.constant 0 : index
    %c0_0 = arith.constant 0 : index
    %0 = vector.load %arg1[%c0, %c0_0] : memref<15x32xf32, #tpu.memory_space<vmem>>, vector<15x32xf32>
    %c0_1 = arith.constant 0 : index
    %c0_2 = arith.constant 0 : index
    %1 = vector.load %arg2[%c0_1, %c0_2] : memref<32x32xf32, #tpu.memory_space<vmem>>, vector<32x32xf32>
    %cst = arith.constant dense<0.000000e+00> : vector<15x32xf32>
    %2 = tpu.matmul %0, %1, %cst {dimension_numbers = #tpu.dot_dimension_numbers<[1], [0], [0], [1], [0, 0, 1, 1], [], []>} : vector<15x32xf32>, vector<32x32xf32>, vector<15x32xf32> -> vector<15x32xf32>
    %c0_3 = arith.constant 0 : index
    %c0_4 = arith.constant 0 : index
    %3 = vector.load %arg3[%c0_3, %c0_4] : memref<1x32xf32, #tpu.memory_space<vmem>>, vector<1x32xf32>
    %4 = vector.broadcast %3 : vector<1x32xf32> to vector<15x32xf32>
    %5 = arith.addf %2, %4 : vector<15x32xf32>
    %c0_5 = arith.constant 0 : index
    %c0_6 = arith.constant 0 : index
    %6 = vector.load %arg4[%c0_5, %c0_6] : memref<15x32xf32, #tpu.memory_space<vmem>>, vector<15x32xf32>
    tpu.vector_store %arg4[%c0_5, %c0_6], %5 {strides = array<i32>} : memref<15x32xf32, #tpu.memory_space<vmem>>, vector<15x32xf32>,
    return
  }
  func.func @transform_0(%arg0: i32) -> (i32, i32) {
    %c0_i32 = arith.constant 0 : i32
    %c0_i32_0 = arith.constant 0 : i32
    return %arg0, %c0_i32 : i32, i32
  }
  func.func @transform_1(%arg0: i32) -> (i32, i32) {
    %c0_i32 = arith.constant 0 : i32
    %c0_i32_0 = arith.constant 0 : i32
    %c0_i32_1 = arith.constant 0 : i32
    return %c0_i32, %c0_i32_0 : i32, i32
  }
  func.func @transform_2(%arg0: i32) -> (i32, i32) {
    %c0_i32 = arith.constant 0 : i32
    %c0_i32_0 = arith.constant 0 : i32
    %c0_i32_1 = arith.constant 0 : i32
    return %c0_i32, %c0_i32_0 : i32, i32
  }
  func.func @transform_3(%arg0: i32) -> (i32, i32) {
    %c0_i32 = arith.constant 0 : i32
    %c0_i32_0 = arith.constant 0 : i32
    return %arg0, %c0_i32 : i32, i32
  }
}

module attributes {stable_mosaic.version = 11 : i64} {
  func.func @_linear_kernel(%arg0: i32, %arg1: memref<16x32xf32, #tpu.memory_space<vmem>>, %arg2: memref<32x96xf32, #tpu.memory_space<vmem>>, %arg3: memref<1x96xf32, #tpu.memory_space<vmem>>, %arg4: memref<16x96xf32, #tpu.memory_space<vmem>>) attributes {dimension_semantics = [#tpu.dimension_semantics<parallel>], iteration_bounds = array<i64: 1>, scalar_prefetch = 0 : i64, scratch_operands = 0 : i64, tpu.core_type = #tpu.core_type<tc>, window_params = [{transform_indices = @transform_0, window_bounds = array<i64: 16, 32>}, {pipeline_mode = #tpu.pipeline_mode<synchronous>, transform_indices = @transform_1, window_bounds = array<i64: 32, 96>}, {pipeline_mode = #tpu.pipeline_mode<synchronous>, transform_indices = @transform_2, window_bounds = array<i64: 1, 96>}, {transform_indices = @transform_3, window_bounds = array<i64: 16, 96>}]} {
    %c0 = arith.constant 0 : index
    %c0_0 = arith.constant 0 : index
    %0 = vector.load %arg1[%c0, %c0_0] : memref<16x32xf32, #tpu.memory_space<vmem>>, vector<16x32xf32>
    %c0_1 = arith.constant 0 : index
    %c0_2 = arith.constant 0 : index
    %1 = vector.load %arg2[%c0_1, %c0_2] : memref<32x96xf32, #tpu.memory_space<vmem>>, vector<32x96xf32>
    %cst = arith.constant dense<0.000000e+00> : vector<16x96xf32>
    %2 = tpu.matmul %0, %1, %cst {dimension_numbers = #tpu.dot_dimension_numbers<[1], [0], [0], [1], [0, 0, 1, 1], [], []>} : vector<16x32xf32>, vector<32x96xf32>, vector<16x96xf32> -> vector<16x96xf32>
    %c0_3 = arith.constant 0 : index
    %c0_4 = arith.constant 0 : index
    %3 = vector.load %arg3[%c0_3, %c0_4] : memref<1x96xf32, #tpu.memory_space<vmem>>, vector<1x96xf32>
    %4 = vector.broadcast %3 : vector<1x96xf32> to vector<16x96xf32>
    %5 = arith.addf %2, %4 : vector<16x96xf32>
    %c0_5 = arith.constant 0 : index
    %c0_6 = arith.constant 0 : index
    %6 = vector.load %arg4[%c0_5, %c0_6] : memref<16x96xf32, #tpu.memory_space<vmem>>, vector<16x96xf32>
    tpu.vector_store %arg4[%c0_5, %c0_6], %5 {strides = array<i32>} : memref<16x96xf32, #tpu.memory_space<vmem>>, vector<16x96xf32>,
    return
  }
  func.func @transform_0(%arg0: i32) -> (i32, i32) {
    %c0_i32 = arith.constant 0 : i32
    %c0_i32_0 = arith.constant 0 : i32
    return %arg0, %c0_i32 : i32, i32
  }
  func.func @transform_1(%arg0: i32) -> (i32, i32) {
    %c0_i32 = arith.constant 0 : i32
    %c0_i32_0 = arith.constant 0 : i32
    %c0_i32_1 = arith.constant 0 : i32
    return %c0_i32, %c0_i32_0 : i32, i32
  }
  func.func @transform_2(%arg0: i32) -> (i32, i32) {
    %c0_i32 = arith.constant 0 : i32
    %c0_i32_0 = arith.constant 0 : i32
    %c0_i32_1 = arith.constant 0 : i32
    return %c0_i32, %c0_i32_0 : i32, i32
  }
  func.func @transform_3(%arg0: i32) -> (i32, i32) {
    %c0_i32 = arith.constant 0 : i32
    %c0_i32_0 = arith.constant 0 : i32
    return %arg0, %c0_i32 : i32, i32
  }
}

module attributes {stable_mosaic.version = 11 : i64} {
  func.func @_rel_attn_head_kernel(%arg0: i32, %arg1: i32, %arg2: memref<1x1x8x8xf32, #tpu.memory_space<vmem>>, %arg3: memref<1x1x8x8xf32, #tpu.memory_space<vmem>>, %arg4: memref<1x1x8x8xf32, #tpu.memory_space<vmem>>, %arg5: memref<1x15x8xf32, #tpu.memory_space<vmem>>, %arg6: memref<1x1x8xf32, #tpu.memory_space<vmem>>, %arg7: memref<1x1x8xf32, #tpu.memory_space<vmem>>, %arg8: memref<1x1x8x8xf32, #tpu.memory_space<vmem>>) attributes {dimension_semantics = [#tpu.dimension_semantics<parallel>, #tpu.dimension_semantics<parallel>], iteration_bounds = array<i64: 2, 4>, scalar_prefetch = 0 : i64, scratch_operands = 0 : i64, tpu.core_type = #tpu.core_type<tc>, window_params = [{transform_indices = @transform_0, window_bounds = array<i64: 1, 1, 8, 8>}, {transform_indices = @transform_1, window_bounds = array<i64: 1, 1, 8, 8>}, {transform_indices = @transform_2, window_bounds = array<i64: 1, 1, 8, 8>}, {transform_indices = @transform_3, window_bounds = array<i64: 1, 15, 8>}, {transform_indices = @transform_4, window_bounds = array<i64: 1, 1, 8>}, {transform_indices = @transform_5, window_bounds = array<i64: 1, 1, 8>}, {transform_indices = @transform_6, window_bounds = array<i64: 1, 1, 8, 8>}]} {
    %c0 = arith.constant 0 : index
    %c0_0 = arith.constant 0 : index
    %c0_1 = arith.constant 0 : index
    %c0_2 = arith.constant 0 : index
    %0 = vector.load %arg2[%c0, %c0_0, %c0_1, %c0_2] : memref<1x1x8x8xf32, #tpu.memory_space<vmem>>, vector<1x1x8x8xf32>
    %1 = vector.shape_cast %0 : vector<1x1x8x8xf32> to vector<8x8xf32>
    %cst = arith.constant 0.353553385 : f32
    %2 = vector.broadcast %cst : f32 to vector<8x8xf32>
    %3 = arith.mulf %1, %2 : vector<8x8xf32>
    %c0_3 = arith.constant 0 : index
    %c0_4 = arith.constant 0 : index
    %c0_5 = arith.constant 0 : index
    %c0_6 = arith.constant 0 : index
    %4 = vector.load %arg3[%c0_3, %c0_4, %c0_5, %c0_6] : memref<1x1x8x8xf32, #tpu.memory_space<vmem>>, vector<1x1x8x8xf32>
    %5 = vector.shape_cast %4 : vector<1x1x8x8xf32> to vector<8x8xf32>
    %c0_7 = arith.constant 0 : index
    %c0_8 = arith.constant 0 : index
    %c0_9 = arith.constant 0 : index
    %c0_10 = arith.constant 0 : index
    %6 = vector.load %arg4[%c0_7, %c0_8, %c0_9, %c0_10] : memref<1x1x8x8xf32, #tpu.memory_space<vmem>>, vector<1x1x8x8xf32>
    %7 = vector.shape_cast %6 : vector<1x1x8x8xf32> to vector<8x8xf32>
    %c0_11 = arith.constant 0 : index
    %c0_12 = arith.constant 0 : index
    %c0_13 = arith.constant 0 : index
    %8 = vector.load %arg5[%c0_11, %c0_12, %c0_13] : memref<1x15x8xf32, #tpu.memory_space<vmem>>, vector<1x15x8xf32>
    %9 = vector.shape_cast %8 : vector<1x15x8xf32> to vector<15x8xf32>
    %c0_14 = arith.constant 0 : index
    %c0_15 = arith.constant 0 : index
    %c0_16 = arith.constant 0 : index
    %10 = vector.load %arg6[%c0_14, %c0_15, %c0_16] : memref<1x1x8xf32, #tpu.memory_space<vmem>>, vector<1x1x8xf32>
    %11 = vector.shape_cast %10 : vector<1x1x8xf32> to vector<1x8xf32>
    %c0_17 = arith.constant 0 : index
    %c0_18 = arith.constant 0 : index
    %c0_19 = arith.constant 0 : index
    %12 = vector.load %arg7[%c0_17, %c0_18, %c0_19] : memref<1x1x8xf32, #tpu.memory_space<vmem>>, vector<1x1x8xf32>
    %13 = vector.shape_cast %12 : vector<1x1x8xf32> to vector<1x8xf32>
    %14 = tpu.concatenate %5, %9 in 0 : vector<8x8xf32>, vector<15x8xf32> -> vector<23x8xf32>
    %15 = tpu.concatenate %11, %13 in 0 : vector<1x8xf32>, vector<1x8xf32> -> vector<2x8xf32>
    %cst_20 = arith.constant dense<0.000000e+00> : vector<8x23xf32>
    %16 = tpu.matmul %3, %14, %cst_20 {dimension_numbers = #tpu.dot_dimension_numbers<[1], [1], [0], [0], [0, 0, 1, 0], [], []>} : vector<8x8xf32>, vector<23x8xf32>, vector<8x23xf32> -> vector<8x23xf32>
    %cst_21 = arith.constant dense<0.000000e+00> : vector<2x23xf32>
    %17 = tpu.matmul %15, %14, %cst_21 {dimension_numbers = #tpu.dot_dimension_numbers<[1], [1], [0], [0], [0, 0, 1, 0], [], []>} : vector<2x8xf32>, vector<23x8xf32>, vector<2x23xf32> -> vector<2x23xf32>
    %18 = vector.extract_strided_slice %16 {offsets = [0, 0], sizes = [8, 8], strides = [1, 1]} : vector<8x23xf32> to vector<8x8xf32>
    %19 = vector.extract_strided_slice %17 {offsets = [0, 0], sizes = [1, 8], strides = [1, 1]} : vector<2x23xf32> to vector<1x8xf32>
    %20 = vector.broadcast %19 : vector<1x8xf32> to vector<8x8xf32>
    %21 = arith.addf %18, %20 : vector<8x8xf32>
    %22 = vector.extract_strided_slice %16 {offsets = [0, 8], sizes = [8, 15], strides = [1, 1]} : vector<8x23xf32> to vector<8x15xf32>
    %23 = vector.extract_strided_slice %17 {offsets = [1, 8], sizes = [1, 15], strides = [1, 1]} : vector<2x23xf32> to vector<1x15xf32>
    %24 = vector.broadcast %23 : vector<1x15xf32> to vector<8x15xf32>
    %25 = arith.addf %22, %24 : vector<8x15xf32>
    %26 = tpu.iota {dimensions = array<i32: 0>} : vector<8x1xi32>
    %c7_i32 = arith.constant 7 : i32
    %27 = vector.broadcast %c7_i32 : i32 to vector<8x1xi32>
    %28 = arith.subi %27, %26 : vector<8x1xi32>
    %29 = vector.extract_strided_slice %25 {offsets = [0, 1], sizes = [8, 14], strides = [1, 1]} : vector<8x15xf32> to vector<8x14xf32>
    %30 = vector.extract_strided_slice %25 {offsets = [0, 0], sizes = [8, 1], strides = [1, 1]} : vector<8x15xf32> to vector<8x1xf32>
    %31 = tpu.concatenate %29, %30 in 1 : vector<8x14xf32>, vector<8x1xf32> -> vector<8x15xf32>
    %c1_i32 = arith.constant 1 : i32
    %32 = vector.broadcast %c1_i32 : i32 to vector<8x1xi32>
    %33 = arith.andi %28, %32 : vector<8x1xi32>
    %c0_i32 = arith.constant 0 : i32
    %34 = vector.broadcast %c0_i32 : i32 to vector<8x1xi32>
    %35 = arith.cmpi ne, %33, %34 : vector<8x1xi32>
    %36 = vector.shape_cast %35 : vector<8x1xi1> to vector<8x1xi1>
    %37 = vector.broadcast %36 : vector<8x1xi1> to vector<8x15xi1>
    %38 = arith.select %37, %31, %25 : vector<8x15xi1>, vector<8x15xf32>
    %39 = vector.extract_strided_slice %38 {offsets = [0, 2], sizes = [8, 13], strides = [1, 1]} : vector<8x15xf32> to vector<8x13xf32>
    %40 = vector.extract_strided_slice %38 {offsets = [0, 0], sizes = [8, 2], strides = [1, 1]} : vector<8x15xf32> to vector<8x2xf32>
    %41 = tpu.concatenate %39, %40 in 1 : vector<8x13xf32>, vector<8x2xf32> -> vector<8x15xf32>
    %c2_i32 = arith.constant 2 : i32
    %42 = vector.broadcast %c2_i32 : i32 to vector<8x1xi32>
    %43 = arith.andi %28, %42 : vector<8x1xi32>
    %c0_i32_22 = arith.constant 0 : i32
    %44 = vector.broadcast %c0_i32_22 : i32 to vector<8x1xi32>
    %45 = arith.cmpi ne, %43, %44 : vector<8x1xi32>
    %46 = vector.shape_cast %45 : vector<8x1xi1> to vector<8x1xi1>
    %47 = vector.broadcast %46 : vector<8x1xi1> to vector<8x15xi1>
    %48 = arith.select %47, %41, %38 : vector<8x15xi1>, vector<8x15xf32>
    %49 = vector.extract_strided_slice %48 {offsets = [0, 4], sizes = [8, 11], strides = [1, 1]} : vector<8x15xf32> to vector<8x11xf32>
    %50 = vector.extract_strided_slice %48 {offsets = [0, 0], sizes = [8, 4], strides = [1, 1]} : vector<8x15xf32> to vector<8x4xf32>
    %51 = tpu.concatenate %49, %50 in 1 : vector<8x11xf32>, vector<8x4xf32> -> vector<8x15xf32>
    %c4_i32 = arith.constant 4 : i32
    %52 = vector.broadcast %c4_i32 : i32 to vector<8x1xi32>
    %53 = arith.andi %28, %52 : vector<8x1xi32>
    %c0_i32_23 = arith.constant 0 : i32
    %54 = vector.broadcast %c0_i32_23 : i32 to vector<8x1xi32>
    %55 = arith.cmpi ne, %53, %54 : vector<8x1xi32>
    %56 = vector.shape_cast %55 : vector<8x1xi1> to vector<8x1xi1>
    %57 = vector.broadcast %56 : vector<8x1xi1> to vector<8x15xi1>
    %58 = arith.select %57, %51, %48 : vector<8x15xi1>, vector<8x15xf32>
    %59 = vector.extract_strided_slice %58 {offsets = [0, 0], sizes = [8, 8], strides = [1, 1]} : vector<8x15xf32> to vector<8x8xf32>
    %60 = arith.addf %21, %59 : vector<8x8xf32>
    %cst_24 = arith.constant dense<0xFF800000> : vector<8xf32>
    %61 = vector.multi_reduction <maximumf>, %60, %cst_24 [1] : vector<8x8xf32> to vector<8xf32>
    %62 = vector.shape_cast %61 : vector<8xf32> to vector<8x1xf32>
    %63 = vector.broadcast %62 : vector<8x1xf32> to vector<8x8xf32>
    %64 = arith.subf %60, %63 : vector<8x8xf32>
    %65 = math.exp %64 : vector<8x8xf32>
    %cst_25 = arith.constant dense<0.000000e+00> : vector<8xf32>
    %66 = vector.multi_reduction <add>, %65, %cst_25 [1] : vector<8x8xf32> to vector<8xf32>
    %67 = vector.shape_cast %66 : vector<8xf32> to vector<8x1xf32>
    %68 = tpu.reciprocal %67 : vector<8x1xf32> -> vector<8x1xf32>
    %69 = vector.broadcast %68 : vector<8x1xf32> to vector<8x8xf32>
    %70 = arith.mulf %65, %69 : vector<8x8xf32>
    %cst_26 = arith.constant dense<0.000000e+00> : vector<8x8xf32>
    %71 = tpu.matmul %70, %7, %cst_26 {dimension_numbers = #tpu.dot_dimension_numbers<[1], [0], [0], [1], [0, 0, 1, 1], [], []>} : vector<8x8xf32>, vector<8x8xf32>, vector<8x8xf32> -> vector<8x8xf32>
    %c0_27 = arith.constant 0 : index
    %c0_28 = arith.constant 0 : index
    %c0_29 = arith.constant 0 : index
    %c0_30 = arith.constant 0 : index
    %72 = vector.load %arg8[%c0_27, %c0_28, %c0_29, %c0_30] : memref<1x1x8x8xf32, #tpu.memory_space<vmem>>, vector<1x1x8x8xf32>
    %73 = vector.shape_cast %72 : vector<1x1x8x8xf32> to vector<8x8xf32>
    %74 = vector.shape_cast %71 : vector<8x8xf32> to vector<1x1x8x8xf32>
    tpu.vector_store %arg8[%c0_27, %c0_28, %c0_29, %c0_30], %74 {strides = array<i32>} : memref<1x1x8x8xf32, #tpu.memory_space<vmem>>, vector<1x1x8x8xf32>,
    return
  }
  func.func @transform_0(%arg0: i32, %arg1: i32) -> (i32, i32, i32, i32) {
    %c0_i32 = arith.constant 0 : i32
    %c0_i32_0 = arith.constant 0 : i32
    %c0_i32_1 = arith.constant 0 : i32
    return %arg0, %arg1, %c0_i32, %c0_i32_0 : i32, i32, i32, i32
  }
  func.func @transform_1(%arg0: i32, %arg1: i32) -> (i32, i32, i32, i32) {
    %c0_i32 = arith.constant 0 : i32
    %c0_i32_0 = arith.constant 0 : i32
    %c0_i32_1 = arith.constant 0 : i32
    return %arg0, %arg1, %c0_i32, %c0_i32_0 : i32, i32, i32, i32
  }
  func.func @transform_2(%arg0: i32, %arg1: i32) -> (i32, i32, i32, i32) {
    %c0_i32 = arith.constant 0 : i32
    %c0_i32_0 = arith.constant 0 : i32
    %c0_i32_1 = arith.constant 0 : i32
    return %arg0, %arg1, %c0_i32, %c0_i32_0 : i32, i32, i32, i32
  }
  func.func @transform_3(%arg0: i32, %arg1: i32) -> (i32, i32, i32) {
    %c0_i32 = arith.constant 0 : i32
    %c0_i32_0 = arith.constant 0 : i32
    %c0_i32_1 = arith.constant 0 : i32
    return %arg1, %c0_i32, %c0_i32_0 : i32, i32, i32
  }
  func.func @transform_4(%arg0: i32, %arg1: i32) -> (i32, i32, i32) {
    %c0_i32 = arith.constant 0 : i32
    %c0_i32_0 = arith.constant 0 : i32
    %c0_i32_1 = arith.constant 0 : i32
    return %arg1, %c0_i32, %c0_i32_0 : i32, i32, i32
  }
  func.func @transform_5(%arg0: i32, %arg1: i32) -> (i32, i32, i32) {
    %c0_i32 = arith.constant 0 : i32
    %c0_i32_0 = arith.constant 0 : i32
    %c0_i32_1 = arith.constant 0 : i32
    return %arg1, %c0_i32, %c0_i32_0 : i32, i32, i32
  }
  func.func @transform_6(%arg0: i32, %arg1: i32) -> (i32, i32, i32, i32) {
    %c0_i32 = arith.constant 0 : i32
    %c0_i32_0 = arith.constant 0 : i32
    %c0_i32_1 = arith.constant 0 : i32
    return %arg0, %arg1, %c0_i32, %c0_i32_0 : i32, i32, i32, i32
  }
}

module attributes {stable_mosaic.version = 11 : i64} {
  func.func @_linear_kernel(%arg0: i32, %arg1: memref<16x32xf32, #tpu.memory_space<vmem>>, %arg2: memref<32x32xf32, #tpu.memory_space<vmem>>, %arg3: memref<1x32xf32, #tpu.memory_space<vmem>>, %arg4: memref<16x32xf32, #tpu.memory_space<vmem>>) attributes {dimension_semantics = [#tpu.dimension_semantics<parallel>], iteration_bounds = array<i64: 1>, scalar_prefetch = 0 : i64, scratch_operands = 0 : i64, tpu.core_type = #tpu.core_type<tc>, window_params = [{transform_indices = @transform_0, window_bounds = array<i64: 16, 32>}, {pipeline_mode = #tpu.pipeline_mode<synchronous>, transform_indices = @transform_1, window_bounds = array<i64: 32, 32>}, {pipeline_mode = #tpu.pipeline_mode<synchronous>, transform_indices = @transform_2, window_bounds = array<i64: 1, 32>}, {transform_indices = @transform_3, window_bounds = array<i64: 16, 32>}]} {
    %c0 = arith.constant 0 : index
    %c0_0 = arith.constant 0 : index
    %0 = vector.load %arg1[%c0, %c0_0] : memref<16x32xf32, #tpu.memory_space<vmem>>, vector<16x32xf32>
    %c0_1 = arith.constant 0 : index
    %c0_2 = arith.constant 0 : index
    %1 = vector.load %arg2[%c0_1, %c0_2] : memref<32x32xf32, #tpu.memory_space<vmem>>, vector<32x32xf32>
    %cst = arith.constant dense<0.000000e+00> : vector<16x32xf32>
    %2 = tpu.matmul %0, %1, %cst {dimension_numbers = #tpu.dot_dimension_numbers<[1], [0], [0], [1], [0, 0, 1, 1], [], []>} : vector<16x32xf32>, vector<32x32xf32>, vector<16x32xf32> -> vector<16x32xf32>
    %c0_3 = arith.constant 0 : index
    %c0_4 = arith.constant 0 : index
    %3 = vector.load %arg3[%c0_3, %c0_4] : memref<1x32xf32, #tpu.memory_space<vmem>>, vector<1x32xf32>
    %4 = vector.broadcast %3 : vector<1x32xf32> to vector<16x32xf32>
    %5 = arith.addf %2, %4 : vector<16x32xf32>
    %c0_5 = arith.constant 0 : index
    %c0_6 = arith.constant 0 : index
    %6 = vector.load %arg4[%c0_5, %c0_6] : memref<16x32xf32, #tpu.memory_space<vmem>>, vector<16x32xf32>
    tpu.vector_store %arg4[%c0_5, %c0_6], %5 {strides = array<i32>} : memref<16x32xf32, #tpu.memory_space<vmem>>, vector<16x32xf32>,
    return
  }
  func.func @transform_0(%arg0: i32) -> (i32, i32) {
    %c0_i32 = arith.constant 0 : i32
    %c0_i32_0 = arith.constant 0 : i32
    return %arg0, %c0_i32 : i32, i32
  }
  func.func @transform_1(%arg0: i32) -> (i32, i32) {
    %c0_i32 = arith.constant 0 : i32
    %c0_i32_0 = arith.constant 0 : i32
    %c0_i32_1 = arith.constant 0 : i32
    return %c0_i32, %c0_i32_0 : i32, i32
  }
  func.func @transform_2(%arg0: i32) -> (i32, i32) {
    %c0_i32 = arith.constant 0 : i32
    %c0_i32_0 = arith.constant 0 : i32
    %c0_i32_1 = arith.constant 0 : i32
    return %c0_i32, %c0_i32_0 : i32, i32
  }
  func.func @transform_3(%arg0: i32) -> (i32, i32) {
    %c0_i32 = arith.constant 0 : i32
    %c0_i32_0 = arith.constant 0 : i32
    return %arg0, %c0_i32 : i32, i32
  }
}

</mosaic_0001>

<bundles_post_ra>
// kernel: rel_pos_mha_forward.5
= control target key start
LH: loop header
LB: loop body
LE: loop exit
PB: predicated region body
PF: predicated region fallthrough
CT: control target
= control target key end

     0   :  { %8 = vsyncpa [#allocation3], 0  ;;  %s391_s0 = inlined_call_operand.hbm [shape: f32[15,32], index: 0, kind: input, shape index: {}]   ;;  %s392_s1 = inlined_call_operand.hbm [shape: f32[32,32], index: 1, kind: input, shape index: {}]   ;;  %s393_s2 = inlined_call_operand.hbm [shape: f32[1,32], index: 2, kind: input, shape index: {}]   ;;  %s394_s3 = inlined_call_operand.hbm [shape: f32[15,32], index: 3, kind: output, shape index: {}]  }
   0x1   :  { %9 = vsyncpa [#allocation6], 0 }
   0x2   :  { %10 = vsyncpa [#allocation4], 0  ;;  %s298_s12 = smov [#allocation5]   ;;  %s299_s14 = smov [#allocation2]  }
   0x3   :  { %s28_s13 = sshll.u32 %s298_s12, 4  ;;  %s16_s15 = sshll.u32 %s299_s14, 4  ;;  %s29_s13 = int_to_ptr.vmem [resolvable:$true] %s28_s13  ;;  %s324_s15 = int_to_ptr.vmem [resolvable:$true] %s16_s15 }
   0x4   :  { %s204_s18 = scalar_lea.hbm %s392_s1, 512 }
   0x5   :  { %p205_p0 = scmp.ne.s32.totalorder %s392_s1, %s204_s18  ;;  %p208_p1 = scmp.lt.u32.totalorder %s204_s18, %s392_s1 }
   0x7   :  { %p210_p2 = pnand %p208_p1, %p205_p0 }
   0x9   :  { %213 = shalt.err (!%p210_p2)
}
   0xa   :  { %s214_s23 = scalar_lea.vmem %s29_s13, 512  ;;  %p219_p4 = scmp.lt.s32.totalorder %s29_s13, %s29_s13 }
   0xb   :  { %p215_p3 = scmp.ne.s32.totalorder %s29_s13, %s214_s23  ;;  %p220_p5 = scmp.lt.s32.totalorder %s214_s23, %s214_s23 }
   0xd   :  { %p221_p6 = por %p220_p5, %p219_p4 }
   0xf   :  { %p222_p7 = pnand %p221_p6, %p215_p3 }
  0x11   :  { %225 = shalt.err (!%p222_p7)
}
  0x12   :  { %s300_s24 = smov 128   ;;  %s301_s25 = smov 8  }
  0x13   :  { %34 = dma.hbm_to_vmem [thread:$0]  %s392_s1, 512, %s29_s13, [#allocation6], %s300_s24, %s300_s24, %s301_s25  }
  0x14   :  { %s226_s30 = scalar_lea.hbm %s391_s0, 256 }
  0x15   :  { %p227_p8 = scmp.ne.s32.totalorder %s391_s0, %s226_s30  ;;  %p230_p9 = scmp.lt.u32.totalorder %s226_s30, %s391_s0 }
  0x17   :  { %p232_p10 = pnand %p230_p9, %p227_p8 }
  0x19   :  { %235 = shalt.err (!%p232_p10)
}
  0x1a   :  { %s236_s8 = scalar_lea.vmem %s324_s15, 256  ;;  %p241_p12 = scmp.lt.s32.totalorder %s324_s15, %s324_s15 }
  0x1b   :  { %p237_p11 = scmp.ne.s32.totalorder %s324_s15, %s236_s8  ;;  %p242_p13 = scmp.lt.s32.totalorder %s236_s8, %s236_s8 }
  0x1d   :  { %p243_p0 = por %p242_p13, %p241_p12 }
  0x1f   :  { %p244_p1 = pnand %p243_p0, %p237_p11 }
  0x21   :  { %247 = shalt.err (!%p244_p1)
}
  0x22   :  { %22 = dma.hbm_to_vmem [thread:$0]  %s391_s0, 256, %s324_s15, [#allocation3], %s300_s24, %s300_s24, %s301_s25  }
  0x23   :  { %s302_s10 = smov [#allocation7]   ;;  %s248_s14 = scalar_lea.hbm %s393_s2, 16 }
  0x24   :  { %s41_s11 = sshll.u32 %s302_s10, 4  ;;  %p249_p2 = scmp.ne.s32.totalorder %s393_s2, %s248_s14  ;;  %s42_s11 = int_to_ptr.vmem [resolvable:$true] %s41_s11 }
  0x25   :  { %p252_p3 = scmp.lt.u32.totalorder %s248_s14, %s393_s2 }
  0x27   :  { %p254_p4 = pnand %p252_p3, %p249_p2 }
  0x29   :  { %257 = shalt.err (!%p254_p4)
}
  0x2a   :  { %s258_s20 = scalar_lea.vmem %s42_s11, 16  ;;  %s262_s0 = scalar_lea.vmem %s42_s11, 32 }
  0x2b   :  { %p259_p5 = scmp.ne.s32.totalorder %s42_s11, %s258_s20  ;;  %p263_p6 = scmp.lt.s32.totalorder %s42_s11, %s42_s11 }
  0x2c   :  { %p264_p7 = scmp.lt.s32.totalorder %s262_s0, %s258_s20 }
  0x2e   :  { %p265_p8 = por %p264_p7, %p263_p6 }
  0x30   :  { %p266_p9 = pnand %p265_p8, %p259_p5 }
  0x32   :  { %269 = shalt.err (!%p266_p9)
}
  0x33   :  { %44 = dma.hbm_to_vmem [thread:$0]  %s393_s2, 16, %s42_s11, [#allocation6]  }
  0x34   :  { %292 = dma.done.wait [#allocation3], 256  }
  0x35   :  { %293 = vsyncadd [#allocation3], 4294967040 }
  0x36   :  { %294 = dma.done.wait [#allocation6], 528  }
  0x37   :  { %295 = vsyncadd [#allocation6], 4294966768  ;;  %vm67_vm0 = vcmask 261120   ;;  %v56_v0 = vld [vmem:[#allocation5] sm:$0xff]  ;;  %v57_v1 = vld [vmem:[#allocation5 + $0x8] sm:$0xff]  ;;  %s303_s2 = smov [#allocation8]  }
  0x38   :  { %v58_v2 = vld [vmem:[#allocation5 + $0x10] sm:$0xff]  ;;  %v190_v3 = vpack.c.bf16 %v57_v1, %v56_v0  ;;  %v59_v4 = vld [vmem:[#allocation5 + $0x18] sm:$0xff]  ;;  %v170_v8 = vld [vmem:[#allocation7] ss:$0 sm:$0xff]  ;;  %s157_s22 = sshll.u32 %s303_s2, 4  ;;  %vm150_vm1 = vcmask 260096   ;;  %s158_s22 = int_to_ptr.vmem [resolvable:$true] %s157_s22 }
  0x39   :  { %v54_v5 = vld [vmem:[#allocation2] sm:$0xff]  ;;  %v194_v6 = vpack.c.bf16 %v59_v4, %v58_v2  ;;  %v55_v7 = vld [vmem:[#allocation2 + $0x8] sm:$0x7f]  ;;  %s270_s23 = scalar_lea.vmem %s158_s22, 256  ;;  %p275_p11 = scmp.lt.s32.totalorder %s158_s22, %s158_s22 }
  0x3a   :  { %187 = vmatprep.mubr.msk.f32.mxu0 %vm67_vm0, %v54_v5  ;;  %191 = vmatprep.subr.bf16.mxu0 %v190_v3  ;;  %p271_p10 = scmp.ne.s32.totalorder %s158_s22, %s270_s23  ;;  %p276_p12 = scmp.lt.s32.totalorder %s270_s23, %s270_s23 }
  0x3b   :  { %193 = vmatpush3.bf16.msra.mxu0 %v190_v3 }
  0x3c   :  { %195 = vmatprep.subr.bf16.mxu0 %v194_v6  ;;  %p277_p13 = por %p276_p12, %p275_p11 }
  0x3e   :  { %p278_p0 = pnand %p277_p13, %p271_p10 }
  0x3f   :  { %197 = vmatpush3.bf16.msra.mxu0 %v194_v6 }
  0x42   :  { %188 = vmatmul.mubr.msk.f32.vlgmr.msra.gmra.mrb[0].mxu0 %vm67_vm0, %v55_v7 }
 0x115   :  { %v189_v9 = vpop.f32.mrb[0].mxu0 }
 0x116   :  { %v146_v10 = vadd.f32 %v189_v9, %v170_v8  ;;  %v140_v11 = vpop.f32.mrb[1].mxu0 }
 0x117   :  { %v141_v12 = vadd.f32 %v170_v8, %v140_v11 }
 0x118   :  { %151 = vst.msk [vmem:[#allocation8 + $0x8] sm:$0x7f] %vm150_vm1, %v146_v10 }
 0x119   :  { %149 = vst.msk [vmem:[#allocation8] sm:$0xff] %vm67_vm0, %v141_v12 }
 0x11a   :  { %281 = shalt.err (!%p278_p0)
}
 0x11b   :  { %s282_s28 = scalar_lea.hbm %s394_s3, 256 }
 0x11c   :  { %p283_p1 = scmp.ne.s32.totalorder %s394_s3, %s282_s28  ;;  %p286_p2 = scmp.lt.u32.totalorder %s282_s28, %s394_s3 }
 0x11e   :  { %p288_p3 = pnand %p286_p2, %p283_p1 }
 0x120   :  { %291 = shalt.err (!%p288_p3)
}
 0x121   :  { %163 = dma.vmem_to_hbm [thread:$0]  %s158_s22, 256, %s394_s3, [#allocation4], %s300_s24, %s300_s24, %s301_s25  }
 0x122   :  { %296 = dma.done.wait [#allocation4], 256  }
 0x123   :  { %297 = vsyncadd [#allocation4], 4294967040 }
 0x124   :  { %167 = vsyncpa [#allocation3], 1 }
 0x125   :  { %168 = vsyncpa [#allocation6], 1 }
 0x126   :  { %169 = vsyncpa [#allocation4], 1 }

// kernel: rel_pos_mha_forward.4
= control target key start
LH: loop header
LB: loop body
LE: loop exit
PB: predicated region body
PF: predicated region fallthrough
CT: control target
= control target key end

     0   :  { %8 = vsyncpa [#allocation3], 0  ;;  %s388_s0 = inlined_call_operand.hbm [shape: f32[16,32], index: 0, kind: input, shape index: {}]   ;;  %s389_s1 = inlined_call_operand.hbm [shape: f32[32,96], index: 1, kind: input, shape index: {}]   ;;  %s390_s2 = inlined_call_operand.hbm [shape: f32[1,96], index: 2, kind: input, shape index: {}]   ;;  %s391_s3 = inlined_call_operand.hbm [shape: f32[16,96], index: 3, kind: output, shape index: {}]  }
   0x1   :  { %9 = vsyncpa [#allocation6], 0 }
   0x2   :  { %10 = vsyncpa [#allocation4], 0  ;;  %s298_s12 = smov [#allocation5]   ;;  %s299_s14 = smov [#allocation2]  }
   0x3   :  { %s28_s13 = sshll.u32 %s298_s12, 4  ;;  %s16_s15 = sshll.u32 %s299_s14, 4  ;;  %s29_s13 = int_to_ptr.vmem [resolvable:$true] %s28_s13  ;;  %s324_s15 = int_to_ptr.vmem [resolvable:$true] %s16_s15 }
   0x4   :  { %s204_s18 = scalar_lea.hbm %s389_s1, 512 }
   0x5   :  { %p205_p0 = scmp.ne.s32.totalorder %s389_s1, %s204_s18  ;;  %p208_p1 = scmp.lt.u32.totalorder %s204_s18, %s389_s1 }
   0x7   :  { %p210_p2 = pnand %p208_p1, %p205_p0 }
   0x9   :  { %213 = shalt.err (!%p210_p2)
}
   0xa   :  { %s214_s23 = scalar_lea.vmem %s29_s13, 512  ;;  %p219_p4 = scmp.lt.s32.totalorder %s29_s13, %s29_s13 }
   0xb   :  { %p215_p3 = scmp.ne.s32.totalorder %s29_s13, %s214_s23  ;;  %p220_p5 = scmp.lt.s32.totalorder %s214_s23, %s214_s23 }
   0xd   :  { %p221_p6 = por %p220_p5, %p219_p4 }
   0xf   :  { %p222_p7 = pnand %p221_p6, %p215_p3 }
  0x11   :  { %225 = shalt.err (!%p222_p7)
}
  0x12   :  { %s300_s24 = smov 128   ;;  %s301_s25 = smov 8  }
  0x13   :  { %34 = dma.hbm_to_vmem [thread:$0]  %s389_s1, 512, %s29_s13, [#allocation6], %s300_s24, %s300_s24, %s301_s25  }
  0x14   :  { %s226_s30 = scalar_lea.hbm %s388_s0, 256 }
  0x15   :  { %p227_p8 = scmp.ne.s32.totalorder %s388_s0, %s226_s30  ;;  %p230_p9 = scmp.lt.u32.totalorder %s226_s30, %s388_s0 }
  0x17   :  { %p232_p10 = pnand %p230_p9, %p227_p8 }
  0x19   :  { %235 = shalt.err (!%p232_p10)
}
  0x1a   :  { %s236_s8 = scalar_lea.vmem %s324_s15, 256  ;;  %p241_p12 = scmp.lt.s32.totalorder %s324_s15, %s324_s15 }
  0x1b   :  { %p237_p11 = scmp.ne.s32.totalorder %s324_s15, %s236_s8  ;;  %p242_p13 = scmp.lt.s32.totalorder %s236_s8, %s236_s8 }
  0x1d   :  { %p243_p0 = por %p242_p13, %p241_p12 }
  0x1f   :  { %p244_p1 = pnand %p243_p0, %p237_p11 }
  0x21   :  { %247 = shalt.err (!%p244_p1)
}
  0x22   :  { %22 = dma.hbm_to_vmem [thread:$0]  %s388_s0, 256, %s324_s15, [#allocation3], %s300_s24, %s300_s24, %s301_s25  }
  0x23   :  { %s302_s10 = smov [#allocation7]   ;;  %s248_s14 = scalar_lea.hbm %s390_s2, 16 }
  0x24   :  { %s41_s11 = sshll.u32 %s302_s10, 4  ;;  %p249_p2 = scmp.ne.s32.totalorder %s390_s2, %s248_s14  ;;  %s42_s11 = int_to_ptr.vmem [resolvable:$true] %s41_s11 }
  0x25   :  { %p252_p3 = scmp.lt.u32.totalorder %s248_s14, %s390_s2 }
  0x27   :  { %p254_p4 = pnand %p252_p3, %p249_p2 }
  0x29   :  { %257 = shalt.err (!%p254_p4)
}
  0x2a   :  { %s258_s20 = scalar_lea.vmem %s42_s11, 16  ;;  %s262_s0 = scalar_lea.vmem %s42_s11, 32 }
  0x2b   :  { %p259_p5 = scmp.ne.s32.totalorder %s42_s11, %s258_s20  ;;  %p263_p6 = scmp.lt.s32.totalorder %s42_s11, %s42_s11 }
  0x2c   :  { %p264_p7 = scmp.lt.s32.totalorder %s262_s0, %s258_s20 }
  0x2e   :  { %p265_p8 = por %p264_p7, %p263_p6 }
  0x30   :  { %p266_p9 = pnand %p265_p8, %p259_p5 }
  0x32   :  { %269 = shalt.err (!%p266_p9)
}
  0x33   :  { %44 = dma.hbm_to_vmem [thread:$0]  %s390_s2, 16, %s42_s11, [#allocation6]  }
  0x34   :  { %292 = dma.done.wait [#allocation3], 256  }
  0x35   :  { %293 = vsyncadd [#allocation3], 4294967040 }
  0x36   :  { %294 = dma.done.wait [#allocation6], 528  }
  0x37   :  { %295 = vsyncadd [#allocation6], 4294966768  ;;  %vm67_vm0 = vcmask 261120   ;;  %v56_v0 = vld [vmem:[#allocation5] sm:$0xff]  ;;  %v57_v1 = vld [vmem:[#allocation5 + $0x8] sm:$0xff]  ;;  %s303_s2 = smov [#allocation8]  }
  0x38   :  { %v58_v2 = vld [vmem:[#allocation5 + $0x10] sm:$0xff]  ;;  %v190_v3 = vpack.c.bf16 %v57_v1, %v56_v0  ;;  %v59_v4 = vld [vmem:[#allocation5 + $0x18] sm:$0xff]  ;;  %v170_v8 = vld [vmem:[#allocation7] ss:$0 sm:$0xff]  ;;  %s157_s22 = sshll.u32 %s303_s2, 4  ;;  %vm149_vm1 = vcmask 785408   ;;  %s158_s22 = int_to_ptr.vmem [resolvable:$true] %s157_s22 }
  0x39   :  { %v54_v5 = vld [vmem:[#allocation2] sm:$0xff]  ;;  %v194_v6 = vpack.c.bf16 %v59_v4, %v58_v2  ;;  %v55_v7 = vld [vmem:[#allocation2 + $0x8] sm:$0xff]  ;;  %s270_s23 = scalar_lea.vmem %s158_s22, 256  ;;  %p275_p11 = scmp.lt.s32.totalorder %s158_s22, %s158_s22 }
  0x3a   :  { %187 = vmatprep.mubr.msk.f32.mxu0 %vm67_vm0, %v54_v5  ;;  %191 = vmatprep.subr.bf16.mxu0 %v190_v3  ;;  %p271_p10 = scmp.ne.s32.totalorder %s158_s22, %s270_s23  ;;  %p276_p12 = scmp.lt.s32.totalorder %s270_s23, %s270_s23 }
  0x3b   :  { %193 = vmatpush3.bf16.msra.mxu0 %v190_v3 }
  0x3c   :  { %195 = vmatprep.subr.bf16.mxu0 %v194_v6  ;;  %p277_p13 = por %p276_p12, %p275_p11 }
  0x3e   :  { %p278_p0 = pnand %p277_p13, %p271_p10 }
  0x3f   :  { %197 = vmatpush3.bf16.msra.mxu0 %v194_v6 }
  0x42   :  { %188 = vmatmul.mubr.msk.f32.vlgmr.msra.gmra.mrb[0].mxu0 %vm67_vm0, %v55_v7 }
 0x115   :  { %v189_v9 = vpop.f32.mrb[0].mxu0 }
 0x116   :  { %v146_v10 = vadd.f32 %v189_v9, %v170_v8  ;;  %v140_v11 = vpop.f32.mrb[1].mxu0 }
 0x117   :  { %v141_v12 = vadd.f32 %v170_v8, %v140_v11 }
 0x118   :  { %151 = vst.msk [vmem:[#allocation8 + $0x8] sm:$0xff] %vm149_vm1, %v146_v10 }
 0x119   :  { %150 = vst.msk [vmem:[#allocation8] sm:$0xff] %vm149_vm1, %v141_v12 }
 0x11a   :  { %281 = shalt.err (!%p278_p0)
}
 0x11b   :  { %s282_s28 = scalar_lea.hbm %s391_s3, 256 }
 0x11c   :  { %p283_p1 = scmp.ne.s32.totalorder %s391_s3, %s282_s28  ;;  %p286_p2 = scmp.lt.u32.totalorder %s282_s28, %s391_s3 }
 0x11e   :  { %p288_p3 = pnand %p286_p2, %p283_p1 }
 0x120   :  { %291 = shalt.err (!%p288_p3)
}
 0x121   :  { %163 = dma.vmem_to_hbm [thread:$0]  %s158_s22, 256, %s391_s3, [#allocation4], %s300_s24, %s300_s24, %s301_s25  }
 0x122   :  { %296 = dma.done.wait [#allocation4], 256  }
 0x123   :  { %297 = vsyncadd [#allocation4], 4294967040 }
 0x124   :  { %167 = vsyncpa [#allocation3], 1 }
 0x125   :  { %168 = vsyncpa [#allocation6], 1 }
 0x126   :  { %169 = vsyncpa [#allocation4], 1 }

// kernel: rel_pos_mha_forward.7
= control target key start
LH: loop header
LB: loop body
LE: loop exit
PB: predicated region body
PF: predicated region fallthrough
CT: control target
= control target key end

     0   :  { %8 = vsyncpa [#allocation3], 0  ;;  %s391_s0 = inlined_call_operand.hbm [shape: f32[16,32], index: 0, kind: input, shape index: {}]   ;;  %s392_s1 = inlined_call_operand.hbm [shape: f32[32,32], index: 1, kind: input, shape index: {}]   ;;  %s393_s2 = inlined_call_operand.hbm [shape: f32[1,32], index: 2, kind: input, shape index: {}]   ;;  %s394_s3 = inlined_call_operand.hbm [shape: f32[16,32], index: 3, kind: output, shape index: {}]  }
   0x1   :  { %9 = vsyncpa [#allocation6], 0 }
   0x2   :  { %10 = vsyncpa [#allocation4], 0  ;;  %s297_s12 = smov [#allocation5]   ;;  %s298_s14 = smov [#allocation2]  }
   0x3   :  { %s28_s13 = sshll.u32 %s297_s12, 4  ;;  %s16_s15 = sshll.u32 %s298_s14, 4  ;;  %s29_s13 = int_to_ptr.vmem [resolvable:$true] %s28_s13  ;;  %s323_s15 = int_to_ptr.vmem [resolvable:$true] %s16_s15 }
   0x4   :  { %s203_s18 = scalar_lea.hbm %s392_s1, 512 }
   0x5   :  { %p204_p0 = scmp.ne.s32.totalorder %s392_s1, %s203_s18  ;;  %p207_p1 = scmp.lt.u32.totalorder %s203_s18, %s392_s1 }
   0x7   :  { %p209_p2 = pnand %p207_p1, %p204_p0 }
   0x9   :  { %212 = shalt.err (!%p209_p2)
}
   0xa   :  { %s213_s23 = scalar_lea.vmem %s29_s13, 512  ;;  %p218_p4 = scmp.lt.s32.totalorder %s29_s13, %s29_s13 }
   0xb   :  { %p214_p3 = scmp.ne.s32.totalorder %s29_s13, %s213_s23  ;;  %p219_p5 = scmp.lt.s32.totalorder %s213_s23, %s213_s23 }
   0xd   :  { %p220_p6 = por %p219_p5, %p218_p4 }
   0xf   :  { %p221_p7 = pnand %p220_p6, %p214_p3 }
  0x11   :  { %224 = shalt.err (!%p221_p7)
}
  0x12   :  { %s299_s24 = smov 128   ;;  %s300_s25 = smov 8  }
  0x13   :  { %34 = dma.hbm_to_vmem [thread:$0]  %s392_s1, 512, %s29_s13, [#allocation6], %s299_s24, %s299_s24, %s300_s25  }
  0x14   :  { %s225_s30 = scalar_lea.hbm %s391_s0, 256 }
  0x15   :  { %p226_p8 = scmp.ne.s32.totalorder %s391_s0, %s225_s30  ;;  %p229_p9 = scmp.lt.u32.totalorder %s225_s30, %s391_s0 }
  0x17   :  { %p231_p10 = pnand %p229_p9, %p226_p8 }
  0x19   :  { %234 = shalt.err (!%p231_p10)
}
  0x1a   :  { %s235_s8 = scalar_lea.vmem %s323_s15, 256  ;;  %p240_p12 = scmp.lt.s32.totalorder %s323_s15, %s323_s15 }
  0x1b   :  { %p236_p11 = scmp.ne.s32.totalorder %s323_s15, %s235_s8  ;;  %p241_p13 = scmp.lt.s32.totalorder %s235_s8, %s235_s8 }
  0x1d   :  { %p242_p0 = por %p241_p13, %p240_p12 }
  0x1f   :  { %p243_p1 = pnand %p242_p0, %p236_p11 }
  0x21   :  { %246 = shalt.err (!%p243_p1)
}
  0x22   :  { %22 = dma.hbm_to_vmem [thread:$0]  %s391_s0, 256, %s323_s15, [#allocation3], %s299_s24, %s299_s24, %s300_s25  }
  0x23   :  { %s301_s10 = smov [#allocation7]   ;;  %s247_s14 = scalar_lea.hbm %s393_s2, 16 }
  0x24   :  { %s41_s11 = sshll.u32 %s301_s10, 4  ;;  %p248_p2 = scmp.ne.s32.totalorder %s393_s2, %s247_s14  ;;  %s42_s11 = int_to_ptr.vmem [resolvable:$true] %s41_s11 }
  0x25   :  { %p251_p3 = scmp.lt.u32.totalorder %s247_s14, %s393_s2 }
  0x27   :  { %p253_p4 = pnand %p251_p3, %p248_p2 }
  0x29   :  { %256 = shalt.err (!%p253_p4)
}
  0x2a   :  { %s257_s20 = scalar_lea.vmem %s42_s11, 16  ;;  %s261_s0 = scalar_lea.vmem %s42_s11, 32 }
  0x2b   :  { %p258_p5 = scmp.ne.s32.totalorder %s42_s11, %s257_s20  ;;  %p262_p6 = scmp.lt.s32.totalorder %s42_s11, %s42_s11 }
  0x2c   :  { %p263_p7 = scmp.lt.s32.totalorder %s261_s0, %s257_s20 }
  0x2e   :  { %p264_p8 = por %p263_p7, %p262_p6 }
  0x30   :  { %p265_p9 = pnand %p264_p8, %p258_p5 }
  0x32   :  { %268 = shalt.err (!%p265_p9)
}
  0x33   :  { %44 = dma.hbm_to_vmem [thread:$0]  %s393_s2, 16, %s42_s11, [#allocation6]  }
  0x34   :  { %291 = dma.done.wait [#allocation3], 256  }
  0x35   :  { %292 = vsyncadd [#allocation3], 4294967040 }
  0x36   :  { %293 = dma.done.wait [#allocation6], 528  }
  0x37   :  { %294 = vsyncadd [#allocation6], 4294966768  ;;  %vm67_vm0 = vcmask 261120   ;;  %v56_v0 = vld [vmem:[#allocation5] sm:$0xff]  ;;  %v57_v1 = vld [vmem:[#allocation5 + $0x8] sm:$0xff]  ;;  %s302_s2 = smov [#allocation8]  }
  0x38   :  { %v58_v2 = vld [vmem:[#allocation5 + $0x10] sm:$0xff]  ;;  %v189_v3 = vpack.c.bf16 %v57_v1, %v56_v0  ;;  %v59_v4 = vld [vmem:[#allocation5 + $0x18] sm:$0xff]  ;;  %v169_v8 = vld [vmem:[#allocation7] ss:$0 sm:$0xff]  ;;  %s156_s22 = sshll.u32 %s302_s2, 4  ;;  %s157_s22 = int_to_ptr.vmem [resolvable:$true] %s156_s22 }
  0x39   :  { %v54_v5 = vld [vmem:[#allocation2] sm:$0xff]  ;;  %v193_v6 = vpack.c.bf16 %v59_v4, %v58_v2  ;;  %v55_v7 = vld [vmem:[#allocation2 + $0x8] sm:$0xff]  ;;  %s269_s23 = scalar_lea.vmem %s157_s22, 256  ;;  %p274_p11 = scmp.lt.s32.totalorder %s157_s22, %s157_s22 }
  0x3a   :  { %186 = vmatprep.mubr.msk.f32.mxu0 %vm67_vm0, %v54_v5  ;;  %190 = vmatprep.subr.bf16.mxu0 %v189_v3  ;;  %p270_p10 = scmp.ne.s32.totalorder %s157_s22, %s269_s23  ;;  %p275_p12 = scmp.lt.s32.totalorder %s269_s23, %s269_s23 }
  0x3b   :  { %192 = vmatpush3.bf16.msra.mxu0 %v189_v3 }
  0x3c   :  { %194 = vmatprep.subr.bf16.mxu0 %v193_v6  ;;  %p276_p13 = por %p275_p12, %p274_p11 }
  0x3e   :  { %p277_p0 = pnand %p276_p13, %p270_p10 }
  0x3f   :  { %196 = vmatpush3.bf16.msra.mxu0 %v193_v6 }
  0x42   :  { %187 = vmatmul.mubr.msk.f32.vlgmr.msra.gmra.mrb[0].mxu0 %vm67_vm0, %v55_v7 }
 0x115   :  { %v188_v9 = vpop.f32.mrb[0].mxu0 }
 0x116   :  { %v146_v10 = vadd.f32 %v188_v9, %v169_v8  ;;  %v140_v11 = vpop.f32.mrb[1].mxu0 }
 0x117   :  { %v141_v12 = vadd.f32 %v169_v8, %v140_v11 }
 0x118   :  { %150 = vst.msk [vmem:[#allocation8 + $0x8] sm:$0xff] %vm67_vm0, %v146_v10 }
 0x119   :  { %149 = vst.msk [vmem:[#allocation8] sm:$0xff] %vm67_vm0, %v141_v12 }
 0x11a   :  { %280 = shalt.err (!%p277_p0)
}
 0x11b   :  { %s281_s28 = scalar_lea.hbm %s394_s3, 256 }
 0x11c   :  { %p282_p1 = scmp.ne.s32.totalorder %s394_s3, %s281_s28  ;;  %p285_p2 = scmp.lt.u32.totalorder %s281_s28, %s394_s3 }
 0x11e   :  { %p287_p3 = pnand %p285_p2, %p282_p1 }
 0x120   :  { %290 = shalt.err (!%p287_p3)
}
 0x121   :  { %162 = dma.vmem_to_hbm [thread:$0]  %s157_s22, 256, %s394_s3, [#allocation4], %s299_s24, %s299_s24, %s300_s25  }
 0x122   :  { %295 = dma.done.wait [#allocation4], 256  }
 0x123   :  { %296 = vsyncadd [#allocation4], 4294967040 }
 0x124   :  { %166 = vsyncpa [#allocation3], 1 }
 0x125   :  { %167 = vsyncpa [#allocation6], 1 }
 0x126   :  { %168 = vsyncpa [#allocation4], 1 }

// kernel: rel_pos_mha_forward.6
= control target key start
LH: loop header
LB: loop body
LE: loop exit
PB: predicated region body
PF: predicated region fallthrough
CT: control target
= control target key end

     0   :  { %s2070_s0 = inlined_call_operand.hbm [shape: f32[2,4,8,8], index: 0, kind: input, shape index: {}]   ;;  %s2071_s1 = inlined_call_operand.hbm [shape: f32[2,4,8,8], index: 1, kind: input, shape index: {}]   ;;  %s2072_s2 = inlined_call_operand.hbm [shape: f32[2,4,8,8], index: 2, kind: input, shape index: {}]   ;;  %s2073_s3 = inlined_call_operand.hbm [shape: f32[4,15,8], index: 3, kind: input, shape index: {}]   ;;  %s2074_s4 = inlined_call_operand.hbm [shape: f32[4,1,8], index: 4, kind: input, shape index: {}]   ;;  %s2075_s5 = inlined_call_operand.hbm [shape: f32[4,1,8], index: 5, kind: input, shape index: {}]   ;;  %s2076_s6 = inlined_call_operand.hbm [shape: f32[2,4,8,8], index: 6, kind: output, shape index: {}]  }
   0x1   :  { %2106 = sst [smem:[#allocation34_spill]] %s2071_s1 }
   0x2   :  { %2107 = sst [smem:[#allocation35_spill]] %s2073_s3 }
   0x3   :  { %2108 = sst [smem:[#allocation36_spill]] %s2076_s6 }
   0x4   :  { %11 = vsyncpa [#allocation3], 0 }
   0x5   :  { %13 = vsyncpa [#allocation3 + $0x1], 0 }
   0x6   :  { %14 = vsyncpa [#allocation6], 0 }
   0x7   :  { %16 = vsyncpa [#allocation6 + $0x1], 0 }
   0x8   :  { %17 = vsyncpa [#allocation9], 0 }
   0x9   :  { %19 = vsyncpa [#allocation9 + $0x1], 0 }
   0xa   :  { %20 = vsyncpa [#allocation12], 0 }
   0xb   :  { %22 = vsyncpa [#allocation12 + $0x1], 0 }
   0xc   :  { %23 = vsyncpa [#allocation4], 0 }
   0xd   :  { %25 = vsyncpa [#allocation4 + $0x1], 0  ;;  %s1587_s21 = smov 0   ;;  %s1589_s22 = smov 0  }
   0xe   :  { %s1591_s23 = smov 0   ;;  %s1593_s24 = smov 0  }
   0xf   :  { %s1595_s25 = smov 0   ;;  %s1597_s26 = smov 0  }
  0x10   :  { %s1599_s27 = smov 0   ;;  %s1601_s28 = smov 0  }
  0x11   :  { %s1603_s29 = smov 0   ;;  %s1605_s30 = smov 0  }
  0x12   :  { %s1607_s7 = smov 0  }
  0x13 LB: > { %2109 = sst [smem:[#allocation19_spill]] %s1495_s22  ;;  %s1643_s8 = sadd.s32 4294967295, %s1531_s7   ;;  %s1531_s7 = sphi %s1607_s7, %s31_s7   ;;  %s1527_s30 = sphi %s1605_s30, %s2169_s30   ;;  %s1523_s29 = sphi %s1603_s29, %s2174_s29   ;;  %s1519_s28 = sphi %s1601_s28, %s2167_s28   ;;  %s1515_s27 = sphi %s1599_s27, %s2173_s27   ;;  %s1511_s26 = sphi %s1597_s26, %s2172_s26   ;;  %s1507_s25 = sphi %s1595_s25, %s2171_s25   ;;  %s1503_s24 = sphi %s1593_s24, %s2170_s24   ;;  %s1499_s23 = sphi %s1591_s23, %s2165_s23   ;;  %s1495_s22 = sphi %s1589_s22, %s2164_s22   ;;  %s1491_s21 = sphi %s1587_s21, %s2163_s21  }
  0x14   : > { %2110 = sst [smem:[#allocation20_spill]] %s1499_s23  ;;  %s994_s9 = sadd.s32 4294967294, %s1531_s7  }
  0x15   : > { %2111 = sst [smem:[#allocation21_spill]] %s1503_s24  ;;  %s40_s10 = sadd.s32 1, %s1523_s29 }
  0x16   : > { %2112 = sst [smem:[#allocation22_spill]] %s1515_s27  ;;  %s43_s11 = sadd.s32 1, %s1527_s30 }
  0x17   : > { %2113 = sst [smem:[#allocation23_spill]] %s1519_s28  ;;  %p41_p0 = scmp.ge.s32.totalorder %s40_s10, 4 }
  0x18   : > { %2114 = sst [smem:[#allocation24_spill]] %s1527_s30  ;;  %s52_s12 = sadd.s32 1, %s1511_s26 }
  0x19   : > { %2115 = sst [smem:[#allocation25_spill]] %s1531_s7  ;;  %p59_p1 = scmp.ne.s32.totalorder %s1511_s26, %s1507_s25 }
  0x1a   : > { %2116 = sst [smem:[#allocation26_spill]] %s1643_s8  ;;  %p60_p2 = scmp.eq.s32.totalorder %s1531_s7, 0 }
  0x1b   : > { %s2176_s10 = smov (%p41_p0, %s40_s10), 0  ;;  %s2178_s11 = smov (!%p41_p0, %s43_s11), %s1527_s30 }
  0x1c   : > { %2117 = sst [smem:[#allocation27_spill]] %s2176_s10  ;;  %s48_s13 = ssub.s32 %s1523_s29, %s2176_s10 }
  0x1d   : > { %p1662_p3 = por %p60_p2, %p59_p1  ;;  %p45_p4 = scmp.ge.s32.totalorder %s2178_s11, 2 }
  0x1e   : > { %p2079_p5 = scmp.ne.s32.totalorder %s1507_s25, %s1503_s24  ;;  %p66_p6 = scmp.eq.s32.totalorder %s1643_s8, 0 }
  0x1f   : > { %p132_p7 = scmp.eq.s32.totalorder %s48_s13, 0  ;;  %s2180_s11 = smov (%p45_p4, %s2178_s11), 0 }
  0x20   : > { %2119 = sst [smem:[#allocation28_spill]] %s2180_s11  ;;  %p1676_p8 = por %p66_p6, %p2079_p5 }
  0x21   : > { %s134_s16 = sadd.s32 1, %s1499_s23  ;;  %s47_s17 = ssub.s32 %s1527_s30, %s2180_s11 }
  0x22   : > { %s2120_s15 = scalar_select %p1676_p8, 1, 0 }
  0x23   : > { %p141_p9 = scmp.ne.s32.totalorder %s1499_s23, %s1495_s22  ;;  %s49_s18 = sor.u32 %s48_s13, %s47_s17 }
  0x24   : > { %p147_p10 = scmp.ne.s32.totalorder %s1495_s22, %s1491_s21  ;;  %p50_p11 = scmp.eq.s32.totalorder %s49_s18, 0 }
  0x25   : > { %p1689_p12 = por %p141_p9, %p60_p2  ;;  %p225_p0 = scmp.eq.s32.totalorder %s1643_s8, 7 }
  0x26   : > { %s1694_s20 = scalar_select %p132_p7, %s1499_s23, %s134_s16  }
  0x27   : > { %s1697_s10 = scalar_select %p50_p11, %s1511_s26, %s52_s12  }
  0x28   : > { %2122 = sst [smem:[#allocation29_spill]] %s1694_s20  ;;  %p1701_p13 = por %p147_p10, %p66_p6 }
  0x29   : > { %2123 = sst [smem:[#allocation30_spill]] %s1697_s10  ;;  %p231_p4 = scmp.eq.s32.totalorder %s994_s9, 7 }
  0x2a   : > { %s2124_s11 = scalar_select %p1701_p13, 1, 0 }
  0x2b   : > { %p1709_p5 = por %p225_p0, %p59_p1  ;;  %p1111_p2 = scmp.lt.s32.totalorder %s1531_s7, 8 }
  0x2c   : > { %2125 = sst [smem:[#allocation31_spill]] %s2124_s11  ;;  %p2128_p7 = scmp.ne.s32.totalorder %s1507_s25, %s1503_s24 }
  0x2d   : > { %s2126_s21 = scalar_select %p1709_p5, 1, 0 }
  0x2e   : > { %p1717_p9 = por %p231_p4, %p2128_p7  ;;  %s2083_s13 = sand.u32 1, %s1511_s26  }
  0x2f   : > { %2127 = sst [smem:[#allocation32_spill]] %s2126_s21  ;;  %s1724_s16 = sshll.u32 %s2083_s13, 3 }
  0x30   : > { %s2129_s12 = scalar_select %p1717_p9, 1, 0 }
  0x31   : > { %s998_s17 = sshll.u32 %s1527_s30, 2  ;;  %p1732_p6 = pnand %p1111_p2, %p1662_p3 }
  0x32   : > { %2130 = sst [smem:[#allocation33_spill]] %s2129_s12  ;;  %s260_s18 = sadd.s32 %s1523_s29, %s998_s17 }
  0x33   : > { %s2131_s9 = scalar_select %p1732_p6, 1, 0 }
  0x34   : > { %s1736_s10 = sshll.u32 %s260_s18, 7  ;;  %s2088_s20 = sand.u32 1, %s1531_s7  }
  0x35   : > { %s2132_s1 = sld [smem:[#allocation34_spill]]  ;;  %s275_s14 = scalar_lea.vmem [#allocation5], %s1724_s16 }
  0x36   : > { %s284_s17 = sshll.u32 %s275_s14, 4  ;;  %p1752_p1 = pnand %p1111_p2, %p1689_p12  ;;  %s1746_s17 = int_to_ptr.vmem [resolvable:$true] %s284_s17 }
  0x37   : > { %s1758_s13 = scalar_lea.sflag [#allocation6], %s2088_s20  ;;  %p1764_p10 = pneg %p1732_p6 }
  0x38   : > { %s2133_s18 = scalar_select %p1752_p1, 1, 0 }
  0x39   : > { %s2134_s12 = scalar_select %p1764_p10, 1, 0 }
  0x3b   : > { %s1743_s6 = scalar_lea.hbm %s2132_s1, %s1736_s10  ;;  %s1222_s30 = scalar_lea.hbm %s2132_s1, 1024 }
  0x3c   : > { %s1217_s24 = scalar_lea.hbm %s1743_s6, 128  ;;  %p1223_p12 = scmp.lt.u32.totalorder %s1743_s6, %s2132_s1 }
  0x3d   : > { %p1218_p3 = scmp.ne.s32.totalorder %s1743_s6, %s1217_s24  ;;  %p1224_p4 = scmp.lt.u32.totalorder %s1222_s30, %s1217_s24 }
  0x3e   : > { %p1226_p7 = scmp.lt.u32.totalorder %s1217_s24, %s1743_s6 }
  0x3f   : > { %p1220_p11 = pnand %p1764_p10, %p1218_p3  ;;  %p1225_p2 = por %p1224_p4, %p1223_p12 }
  0x41   : > { %p1221_p0 = pneg %p1220_p11  ;;  %p1227_p9 = por %p1226_p7, %p1225_p2 }
  0x43   : > { %p1228_p5 = pnand %p1227_p9, %p1221_p0 }
  0x45   : > { %1231 = shalt.err (!%p1228_p5)
}
  0x46   : > { %s1232_s20 = scalar_lea.vmem %s1746_s17, 128  ;;  %s1533_s19 = smov [#allocation5]  }
  0x47   : > { %p1233_p3 = scmp.ne.s32.totalorder %s1746_s17, %s1232_s20  ;;  %s1237_s14 = sshll.u32 %s1533_s19, 4  ;;  %s1238_s14 = int_to_ptr.vmem [resolvable:$false] %s1237_s14 }
  0x48   : > { %s1239_s27 = scalar_lea.vmem %s1238_s14, 256  ;;  %p1240_p8 = scmp.lt.s32.totalorder %s1746_s17, %s1238_s14 }
  0x49   : > { %p1235_p11 = pnand %p1233_p3, %p1764_p10  ;;  %p1241_p1 = scmp.lt.s32.totalorder %s1239_s27, %s1232_s20 }
  0x4b   : > { %p1236_p13 = pneg %p1235_p11  ;;  %p1242_p12 = por %p1241_p1, %p1240_p8 }
  0x4d   : > { %p1243_p4 = pnand %p1242_p12, %p1236_p13 }
  0x4f   : > { %1246 = shalt.err (!%p1243_p4)
}
  0x50   : > { %1094 = dma.hbm_to_vmem [thread:$0]  (!%p1732_p6), %s1743_s6, 128, %s1746_s17, %s1758_s13  }
  0x51   : > { %p1011_p5 = scmp.ge.s32.totalorder %s1531_s7, 1  ;;  %p364_p9 = scmp.lt.s32.totalorder %s1531_s7, 9 }
  0x52   : > { %s1791_s30 = sand.u32 1, %s1499_s23   ;;  %s1032_s21 = sshll.u32 %s1523_s29, 8 }
  0x53   : > { %s1006_s20 = sshll.u32 %s1791_s30, 4  ;;  %p1795_p8 = pnand %p1011_p5, %p364_p9 }
  0x54   : > { %s2136_s3 = sld [smem:[#allocation35_spill]]  ;;  %s315_s6 = scalar_lea.vmem [#allocation8], %s1006_s20 }
  0x55   : > { %s2135_s24 = scalar_select %p1795_p8, 1, 0 }
  0x56   : > { %s322_s17 = sshll.u32 %s315_s6, 4  ;;  %s2137_s1 = sand.u32 1, %s1531_s7   ;;  %s1804_s17 = int_to_ptr.vmem [resolvable:$true] %s322_s17 }
  0x57   : > { %s1808_s23 = scalar_lea.sflag [#allocation9], %s2137_s1  ;;  %p2138_p1 = scmp.ne.s32.totalorder %s2133_s18, 0 }
  0x59   : > { %p1814_p0 = pneg %p2138_p1 }
  0x5a   : > { %s1802_s27 = scalar_lea.hbm %s2136_s3, %s1032_s21  ;;  %s1252_s20 = scalar_lea.hbm %s2136_s3, 1024 }
  0x5b   : > { %s1247_s28 = scalar_lea.hbm %s1802_s27, 256  ;;  %p1253_p3 = scmp.lt.u32.totalorder %s1802_s27, %s2136_s3 }
  0x5c   : > { %p1248_p13 = scmp.ne.s32.totalorder %s1802_s27, %s1247_s28  ;;  %p1254_p11 = scmp.lt.u32.totalorder %s1252_s20, %s1247_s28 }
  0x5d   : > { %s2139_s11 = scalar_select %p1814_p0, 1, 0 }
  0x5e   : > { %p1250_p2 = pnand %p1814_p0, %p1248_p13  ;;  %p1255_p12 = por %p1254_p11, %p1253_p3 }
  0x5f   : > { %p1256_p4 = scmp.lt.u32.totalorder %s1247_s28, %s1802_s27 }
  0x60   : > { %p1251_p7 = pneg %p1250_p2 }
  0x61   : > { %p1257_p5 = por %p1256_p4, %p1255_p12 }
  0x63   : > { %p1258_p9 = pnand %p1257_p5, %p1251_p7 }
  0x65   : > { %1261 = shalt.err (!%p1258_p9)
}
  0x66   : > { %s1262_s1 = scalar_lea.vmem %s1804_s17, 256  ;;  %s1534_s21 = smov [#allocation8]  }
  0x67   : > { %p1263_p13 = scmp.ne.s32.totalorder %s1804_s17, %s1262_s1  ;;  %s1267_s19 = sshll.u32 %s1534_s21, 4  ;;  %s1268_s19 = int_to_ptr.vmem [resolvable:$false] %s1267_s19 }
  0x68   : > { %s1269_s14 = scalar_lea.vmem %s1268_s19, 512  ;;  %p1270_p6 = scmp.lt.s32.totalorder %s1804_s17, %s1268_s19 }
  0x69   : > { %p1265_p2 = pnand %p1263_p13, %p1814_p0  ;;  %p1271_p10 = scmp.lt.s32.totalorder %s1269_s14, %s1262_s1 }
  0x6b   : > { %p1266_p8 = pneg %p1265_p2  ;;  %p1272_p3 = por %p1271_p10, %p1270_p6 }
  0x6d   : > { %p1273_p11 = pnand %p1272_p3, %p1266_p8 }
  0x6f   : > { %1276 = shalt.err (!%p1273_p11)
}
  0x70   : > { %s1535_s28 = smov 128   ;;  %s1536_s20 = smov 8  }
  0x71   : > { %1100 = dma.hbm_to_vmem [thread:$0]  (!%p2138_p1), %s1802_s27, 256, %s1804_s17, %s1808_s23, %s1535_s28, %s1535_s28, %s1536_s20  }
  0x72   : > { %s1842_s1 = scalar_lea.hbm %s2070_s0, %s1736_s10  ;;  %s255_s19 = scalar_lea.vmem [#allocation2], %s1724_s16 }
  0x73   : > { %s264_s14 = sshll.u32 %s255_s19, 4  ;;  %s1851_s22 = scalar_lea.hbm %s2072_s2, %s1736_s10  ;;  %s1845_s14 = int_to_ptr.vmem [resolvable:$true] %s264_s14 }
  0x74   : > { %s2140_s8 = sand.u32 1, %s1511_s26   ;;  %s1277_s17 = scalar_lea.hbm %s1842_s1, 128 }
  0x75   : > { %s252_s27 = scalar_lea.sflag [#allocation3], %s2140_s8  ;;  %p1278_p6 = scmp.ne.s32.totalorder %s1842_s1, %s1277_s17 }
  0x76   : > { %p2141_p10 = scmp.ne.s32.totalorder %s2134_s12, 0  ;;  %s1282_s6 = scalar_lea.hbm %s2070_s0, 1024 }
  0x77   : > { %p1283_p12 = scmp.lt.u32.totalorder %s1842_s1, %s2070_s0  ;;  %p1284_p4 = scmp.lt.u32.totalorder %s1282_s6, %s1277_s17 }
  0x78   : > { %p1280_p8 = pnand %p1278_p6, %p2141_p10  ;;  %p1286_p9 = scmp.lt.u32.totalorder %s1277_s17, %s1842_s1 }
  0x79   : > { %p1285_p5 = por %p1284_p4, %p1283_p12 }
  0x7a   : > { %p1281_p7 = pneg %p1280_p8 }
  0x7b   : > { %p1287_p13 = por %p1286_p9, %p1285_p5 }
  0x7d   : > { %p1288_p2 = pnand %p1287_p13, %p1281_p7 }
  0x7f   : > { %1291 = shalt.err (!%p1288_p2)
}
  0x80   : > { %s1292_s3 = scalar_lea.vmem %s1845_s14, 128  ;;  %s1537_s7 = smov [#allocation2]  }
  0x81   : > { %p1293_p3 = scmp.ne.s32.totalorder %s1845_s14, %s1292_s3  ;;  %s1297_s8 = sshll.u32 %s1537_s7, 4  ;;  %s1298_s8 = int_to_ptr.vmem [resolvable:$false] %s1297_s8 }
  0x82   : > { %s1299_s10 = scalar_lea.vmem %s1298_s8, 256  ;;  %p1300_p8 = scmp.lt.s32.totalorder %s1845_s14, %s1298_s8 }
  0x83   : > { %p1295_p11 = pnand %p1293_p3, %p2141_p10  ;;  %p1301_p1 = scmp.lt.s32.totalorder %s1299_s10, %s1292_s3 }
  0x85   : > { %p1296_p6 = pneg %p1295_p11  ;;  %p1302_p12 = por %p1301_p1, %p1300_p8 }
  0x87   : > { %p1303_p4 = pnand %p1302_p12, %p1296_p6 }
  0x89   : > { %1306 = shalt.err (!%p1303_p4)
}
  0x8a   : > { %p2142_p7 = scmp.ne.s32.totalorder %s2131_s9, 0  ;;  %s295_s17 = scalar_lea.vmem [#allocation7], %s1724_s16 }
  0x8b   : > { %s304_s28 = sshll.u32 %s295_s17, 4  ;;  %s1009_s20 = sshll.u32 %s1523_s29, 4  ;;  %s305_s28 = int_to_ptr.vmem [resolvable:$true] %s304_s28 }
  0x8c   : > { %1091 = dma.hbm_to_vmem [thread:$0]  (!%p2142_p7), %s1842_s1, 128, %s1845_s14, %s252_s27  }
  0x8d   : > { %s1307_s6 = scalar_lea.hbm %s1851_s22, 128  ;;  %s1312_s3 = scalar_lea.hbm %s2072_s2, 1024 }
  0x8e   : > { %p1308_p1 = scmp.ne.s32.totalorder %s1851_s22, %s1307_s6  ;;  %p1313_p13 = scmp.lt.u32.totalorder %s1851_s22, %s2072_s2 }
  0x8f   : > { %p1314_p2 = scmp.lt.u32.totalorder %s1312_s3, %s1307_s6  ;;  %p1316_p11 = scmp.lt.u32.totalorder %s1307_s6, %s1851_s22 }
  0x90   : > { %p1310_p5 = pnand %p1308_p1, %p2141_p10 }
  0x91   : > { %p1315_p3 = por %p1314_p2, %p1313_p13 }
  0x92   : > { %p1311_p9 = pneg %p1310_p5 }
  0x93   : > { %p1317_p6 = por %p1316_p11, %p1315_p3 }
  0x95   : > { %p1318_p8 = pnand %p1317_p6, %p1311_p9 }
  0x97   : > { %1321 = shalt.err (!%p1318_p8)
}
  0x98   : > { %s1322_s16 = scalar_lea.vmem %s305_s28, 128  ;;  %s1538_s1 = smov [#allocation7]  }
  0x99   : > { %p1323_p12 = scmp.ne.s32.totalorder %s305_s28, %s1322_s16  ;;  %s1327_s14 = sshll.u32 %s1538_s1, 4  ;;  %s1328_s14 = int_to_ptr.vmem [resolvable:$false] %s1327_s14 }
  0x9a   : > { %s1329_s27 = scalar_lea.vmem %s1328_s14, 256  ;;  %p1330_p5 = scmp.lt.s32.totalorder %s305_s28, %s1328_s14 }
  0x9b   : > { %p1325_p4 = pnand %p1323_p12, %p2141_p10  ;;  %p1331_p0 = scmp.lt.s32.totalorder %s1329_s27, %s1322_s16 }
  0x9d   : > { %p1326_p1 = pneg %p1325_p4  ;;  %p1332_p7 = por %p1331_p0, %p1330_p5 }
  0x9f   : > { %p1333_p2 = pnand %p1332_p7, %p1326_p1 }
  0xa1   : > { %1336 = shalt.err (!%p1333_p2)
}
  0xa2   : > { %p2143_p13 = scmp.ne.s32.totalorder %s2131_s9, 0  ;;  %s1901_s17 = scalar_lea.hbm %s2074_s4, %s1009_s20 }
  0xa3   : > { %s335_s6 = scalar_lea.vmem [#allocation10], %s1791_s30  ;;  %s1337_s9 = scalar_lea.hbm %s1901_s17, 16 }
  0xa4   : > { %1097 = dma.hbm_to_vmem [thread:$0]  (!%p2143_p13), %s1851_s22, 128, %s305_s28, %s1758_s13  }
  0xa5   : > { %s342_s21 = sshll.u32 %s335_s6, 4  ;;  %p1338_p0 = scmp.ne.s32.totalorder %s1901_s17, %s1337_s9  ;;  %s343_s21 = int_to_ptr.vmem [resolvable:$true] %s342_s21 }
  0xa6   : > { %p2144_p10 = scmp.ne.s32.totalorder %s2139_s11, 0  ;;  %s1342_s13 = scalar_lea.hbm %s2074_s4, 64 }
  0xa7   : > { %p1343_p3 = scmp.lt.u32.totalorder %s1901_s17, %s2074_s4  ;;  %p1344_p11 = scmp.lt.u32.totalorder %s1342_s13, %s1337_s9 }
  0xa8   : > { %p1340_p7 = pnand %p1338_p0, %p2144_p10  ;;  %p1346_p8 = scmp.lt.u32.totalorder %s1337_s9, %s1901_s17 }
  0xa9   : > { %p1345_p6 = por %p1344_p11, %p1343_p3 }
  0xaa   : > { %p1341_p9 = pneg %p1340_p7 }
  0xab   : > { %p1347_p12 = por %p1346_p8, %p1345_p6 }
  0xad   : > { %p1348_p4 = pnand %p1347_p12, %p1341_p9 }
  0xaf   : > { %1351 = shalt.err (!%p1348_p4)
}
  0xb0   : > { %s1352_s7 = scalar_lea.vmem %s343_s21, 16  ;;  %s1539_s8 = smov [#allocation10]  }
  0xb1   : > { %p1353_p1 = scmp.ne.s32.totalorder %s343_s21, %s1352_s7  ;;  %s1357_s16 = sshll.u32 %s1539_s8, 4  ;;  %s1358_s16 = int_to_ptr.vmem [resolvable:$false] %s1357_s16 }
  0xb2   : > { %s1359_s1 = scalar_lea.vmem %s1358_s16, 32  ;;  %p1360_p13 = scmp.lt.s32.totalorder %s343_s21, %s1358_s16 }
  0xb3   : > { %p1355_p5 = pnand %p1353_p1, %p2144_p10  ;;  %p1361_p0 = scmp.lt.s32.totalorder %s1359_s1, %s1352_s7 }
  0xb5   : > { %p1356_p2 = pneg %p1355_p5  ;;  %p1362_p7 = por %p1361_p0, %p1360_p13 }
  0xb7   : > { %p1363_p3 = pnand %p1362_p7, %p1356_p2 }
  0xb9   : > { %1366 = shalt.err (!%p1363_p3)
}
  0xba   : > { %p2145_p11 = scmp.ne.s32.totalorder %s2133_s18, 0  ;;  %s1927_s12 = scalar_lea.hbm %s2075_s5, %s1009_s20 }
  0xbb   : > { %s352_s10 = scalar_lea.vmem [#allocation11], %s1791_s30  ;;  %s350_s9 = scalar_lea.sflag [#allocation12], %s1791_s30 }
  0xbc   : > { %1103 = dma.hbm_to_vmem [thread:$0]  (!%p2145_p11), %s1901_s17, 16, %s343_s21, %s1808_s23  }
  0xbd   : > { %s359_s6 = sshll.u32 %s352_s10, 4  ;;  %s1367_s19 = scalar_lea.hbm %s1927_s12, 16  ;;  %s360_s6 = int_to_ptr.vmem [resolvable:$true] %s359_s6 }
  0xbe   : > { %p1368_p9 = scmp.ne.s32.totalorder %s1927_s12, %s1367_s19  ;;  %s1372_s21 = scalar_lea.hbm %s2075_s5, 64 }
  0xbf   : > { %p1373_p12 = scmp.lt.u32.totalorder %s1927_s12, %s2075_s5  ;;  %p1374_p4 = scmp.lt.u32.totalorder %s1372_s21, %s1367_s19 }
  0xc0   : > { %p1370_p6 = pnand %p1368_p9, %p2144_p10  ;;  %p1376_p5 = scmp.lt.u32.totalorder %s1367_s19, %s1927_s12 }
  0xc1   : > { %p1375_p1 = por %p1374_p4, %p1373_p12 }
  0xc2   : > { %p1371_p8 = pneg %p1370_p6 }
  0xc3   : > { %p1377_p2 = por %p1376_p5, %p1375_p1 }
  0xc5   : > { %p1378_p13 = pnand %p1377_p2, %p1371_p8 }
  0xc7   : > { %1381 = shalt.err (!%p1378_p13)
}
  0xc8   : > { %s1382_s30 = scalar_lea.vmem %s360_s6, 16  ;;  %s1540_s13 = smov [#allocation11]  }
  0xc9   : > { %p1383_p0 = scmp.ne.s32.totalorder %s360_s6, %s1382_s30  ;;  %s1387_s28 = sshll.u32 %s1540_s13, 4  ;;  %s1388_s28 = int_to_ptr.vmem [resolvable:$false] %s1387_s28 }
  0xca   : > { %s1389_s3 = scalar_lea.vmem %s1388_s28, 32  ;;  %p1390_p9 = scmp.lt.s32.totalorder %s360_s6, %s1388_s28 }
  0xcb   : > { %p1385_p7 = pnand %p1383_p0, %p2144_p10  ;;  %p1391_p6 = scmp.lt.s32.totalorder %s1389_s3, %s1382_s30 }
  0xcd   : > { %p1386_p3 = pneg %p1385_p7  ;;  %p1392_p11 = por %p1391_p6, %p1390_p9 }
  0xcf   : > { %p1393_p4 = pnand %p1392_p11, %p1386_p3 }
  0xd1   : > { %1396 = shalt.err (!%p1393_p4)
}
  0xd2   : > { %p2146_p12 = scmp.ne.s32.totalorder %s2133_s18, 0  ;;  %p2147_p8 = scmp.ne.s32.totalorder %s2135_s24, 0 }
  0xd3   : > { %s1951_s11 = sand.u32 (!%p2147_p8), 1, %s1507_s25   ;;  %p2148_p10 = scmp.ne.s32.totalorder (!%p2147_p8), %s2120_s15, 0 }
  0xd4   : > { %1106 = dma.hbm_to_vmem [thread:$0]  (!%p2146_p12), %s1927_s12, 16, %s360_s6, %s350_s9  }
  0xd5   : > { %368 = sbr.rel (%p2147_p8) target bundleno = 1371 (0x55b), region = 44  ;;  %s1954_s7 = sshll.u32 (!%p2147_p8), %s1951_s11, 3 }
  0xd6   : > { %s371_s8 = scalar_lea.sflag (!%p2147_p8), [#allocation3], %s1951_s11  ;;  %s374_s16 = scalar_lea.vmem (!%p2147_p8), [#allocation2], %s1954_s7 }
  0xdc   : > { %1470 = dma.done.wait (%p2148_p10), %s371_s8, 128  }
  0xdd   : > { %1472 = vsyncadd (%p2148_p10), %s371_s8, 4294967168  ;;  %s2149_s18 = sld [smem:[#allocation26_spill]]  ;;  %s383_s14 = scalar_lea.vmem [#allocation5], %s1954_s7 }
  0xe3   : > { %s379_s24 = sand.u32 1, %s2149_s18  }
  0xe4   : > { %s380_s1 = scalar_lea.sflag [#allocation6], %s379_s24 }
  0xe5   : > { %1474 = dma.done.wait (%p2148_p10), %s380_s1, 256  }
  0xe6   : > { %1476 = vsyncadd (%p2148_p10), %s380_s1, 4294967040  ;;  %s2150_s27 = sld [smem:[#allocation19_spill]]  ;;  %s2151_s12 = sld [smem:[#allocation31_spill]] }
  0xe7   : > { %s392_s9 = scalar_lea.vmem [#allocation7], %s1954_s7  ;;  %s398_s19 = scalar_lea.sflag [#allocation9], %s379_s24 }
  0xec   : > { %s1969_s10 = sand.u32 1, %s2150_s27   ;;  %p2152_p11 = scmp.ne.s32.totalorder %s2151_s12, 0 }
  0xed   : > { %s1015_s6 = sshll.u32 %s1969_s10, 4 }
  0xee   : > { %s401_s23 = scalar_lea.vmem [#allocation8], %s1015_s6 }
  0xef   : > { %1478 = dma.done.wait (%p2152_p11), %s398_s19, 272  }
  0xf0   : > { %1480 = vsyncadd (%p2152_p11), %s398_s19, 4294967024  ;;  %s409_s15 = scalar_lea.vmem [#allocation10], %s1969_s10  ;;  %s415_s17 = scalar_lea.sflag [#allocation12], %s1969_s10 }
  0xf1   : > { %s417_s21 = scalar_lea.vmem [#allocation11], %s1969_s10 }
  0xf2   : > { %1482 = dma.done.wait (%p2152_p11), %s415_s17, 16  }
  0xf3   : > { %1484 = vsyncadd (%p2152_p11), %s415_s17, 4294967280  ;;  %v1541_v0 = vmov 0.0|0.0   ;;  %vm1542_vm0 = vmmov 0   ;;  %v1543_v1 = vmov 0.0   ;;  %vm485_vm1 = vcmask 64512   ;;  %v471_v2 = vld [vmem:[%s383_s14] sm:$0xff] }
  0xf4   : > { %1070 = vmatprep.subr.bf16.mxu1 %v1541_v0  ;;  %1066 = vmatprep.subr.bf16.mxu0 %v1541_v0  ;;  %v473_v3 = vld [vmem:[%s401_s23] sm:$0xff]  ;;  %vm1068_vm2 = vmpackc.low %vm485_vm1, %vm485_vm1  ;;  %vm483_vm3 = vcmask 1040384   ;;  %v469_v5 = vld [vmem:[%s374_s16] sm:$0xff]  ;;  %v641_v11 = vlaneseq  ;;  %s1544_s22 = smov 120   ;;  %s1545_s20 = smov 119   ;;  %vm661_vm4 = vcmask 113664  }
  0xf5   : > { %1058 = vmatprep.mubr.msk.f32.mxu1 %vm1542_vm0, %v1543_v1  ;;  %1049 = vmatprep.mubr.msk.f32.mxu0 %vm1542_vm0, %v1543_v1  ;;  %v1067_v4 = vpack.c.bf16 %v473_v3, %v471_v2  ;;  %v474_v6 = vld [vmem:[%s401_s23 + $0x8] sm:$0x7f]  ;;  %v475_v7 = vld [vmem:[%s409_s15] sm:$0x1]  ;;  %v470_v9 = vmul.f32 0.35355338, %v469_v5 }
  0xf6   : > { %v1017_v8 = vld [vmem:[%s417_s21] ss:$0 sm:$0xff]  ;;  %v642_v12 = vshrl.u32 %v641_v11, 7  ;;  %s1546_s30 = smov 6   ;;  %s1547_s13 = smov 13   ;;  %vm678_vm6 = vcmask 105472  }
  0xf7   : > { %1073 = vmatpush3.bf16.xpose.msk.msra.mxu1 %vm1068_vm2, %v1067_v4  ;;  %1069 = vmatpush3.bf16.xpose.msk.msra.mxu0 %vm1068_vm2, %v1067_v4  ;;  %v484_v10 = vsel %vm483_vm3, %v475_v7, %v1017_v8  ;;  %s1548_s28 = smov 126   ;;  %s1549_s3 = smov 11   ;;  %vm692_vm8 = vcmask 89088   ;;  %v472_v47 = vld [vmem:[%s392_s9] sm:$0xff] }
  0xf8   : > { %1056 = vmatprep.subr.mxu1 %v1543_v1  ;;  %1047 = vmatprep.subr.mxu0 %v1543_v1  ;;  %v643_v13 = vsub.s32 0, %v642_v12  ;;  %v648_v14 = vsub.s32 1, %v642_v12  ;;  %v653_v23 = vsub.s32 7, %v642_v12  ;;  %s1550_s8 = smov 124   ;;  %s2153_s16 = sld [smem:[#allocation23_spill]] }
  0xf9   : > { %s2154_s18 = sld [smem:[#allocation22_spill]]  ;;  %s2155_s24 = sld [smem:[#allocation32_spill]] }
  0xfa   : > { %v663_v24 = vand.u32 1, %v653_v23  ;;  %v680_v30 = vand.u32 2, %v653_v23  ;;  %v694_v35 = vand.u32 4, %v653_v23  ;;  %s468_s12 = scalar_lea.vmem [#allocation13], %s1954_s7  ;;  %s2156_s23 = sld [smem:[#allocation36_spill]] }
  0xfb   : > { %s801_s10 = sshll.u32 %s468_s12, 4  ;;  %s786_s9 = scalar_lea.sflag [#allocation4], %s1951_s11  ;;  %s2008_s10 = int_to_ptr.vmem [resolvable:$true] %s801_s10 }
  0xfc   : > { %vm664_vm5 = vcmp.ne.s32.totalorder %v663_v24, 0  ;;  %vm681_vm7 = vcmp.ne.s32.totalorder %v680_v30, 0  ;;  %vm695_vm9 = vcmp.ne.s32.totalorder %v694_v35, 0  ;;  %s1397_s21 = scalar_lea.vmem %s2008_s10, 128  ;;  %s1551_s7 = smov [#allocation13]  }
  0xfd   : > { %p1398_p1 = scmp.ne.s32.totalorder %s2008_s10, %s1397_s21 }
  0xfe   : > { %s1028_s1 = sshll.u32 %s2153_s16, 2 }
  0xff   : > { %1057 = vmatpush3.xpose.msk.msra.mxu1 %vm485_vm1, %v474_v6  ;;  %1048 = vmatpush3.xpose.msk.msra.mxu0 %vm485_vm1, %v474_v6  ;;  %s797_s14 = sadd.s32 %s2154_s18, %s1028_s1  ;;  %p2158_p5 = scmp.ne.s32.totalorder %s2155_s24, 0 }
 0x100   : > { %1061 = vmatprep.subr.mxu0 %v1543_v1  ;;  %s1029_s27 = sshll.u32 %s797_s14, 7  ;;  %s2157_s15 = smov %s2156_s23 }
 0x101   : > { %s2006_s17 = scalar_lea.hbm %s2156_s23, %s1029_s27  ;;  %p1399_p2 = pnand %p1398_p1, %p2158_p5 }
 0x102   : > { %1059 = vmatmul.mubr.msk.f32.vlgmr.msra.gmra.mrb[0].mxu1 %vm485_vm1, %v484_v10  ;;  %1050 = vmatmul.mubr.msk.f32.vlgmr.msra.gmra.mrb[0].mxu0 %vm485_vm1, %v470_v9 }
 0x103   : > { %1063 = vmatprep.mubr.msk.f32.mxu0 %vm1542_vm0, %v1543_v1  ;;  %1062 = vmatpush3.msra.mxu0 %v472_v47  ;;  %p1400_p13 = pneg %p1399_p2 }
 0x1d5   : > { %v637_v15 = vpop.f32.mrb[0].mxu1  ;;  %v564_v16 = vpop.f32.mrb[0].mxu0 }
 0x1d6   : > { %v644_v17 = vrot.slane %v637_v15, %v643_v13  ;;  %v649_v18 = vrot.slane %v637_v15, %v648_v14  ;;  %v1060_v19 = vpop.f32.mrb[1].mxu1  ;;  %v1051_v20 = vpop.f32.mrb[1].mxu0 }
 0x1d8   : > { %v645_v21 = vadd.f32 %v644_v17, %v564_v16  ;;  %v650_v22 = vadd.f32 %v649_v18, %v564_v16 }
 0x1da   : > { %667 = vrot.lane.b32.xlu1 %v650_v22, %s1544_s22  ;;  %655 = vrot.lane.b32.xlu0 %v650_v22, %s1545_s20  ;;  %s1401_s22 = sshll.u32 %s1551_s7, 4  ;;  %s1402_s22 = int_to_ptr.vmem [resolvable:$false] %s1401_s22 }
 0x1db   : > { %s1403_s20 = scalar_lea.vmem %s1402_s22, 256  ;;  %p1404_p0 = scmp.lt.s32.totalorder %s2008_s10, %s1402_s22 }
 0x1dc   : > { %p1405_p7 = scmp.lt.s32.totalorder %s1403_s20, %s1397_s21 }
 0x1de   : > { %658 = vrot.lane.b32.xlu0 %v650_v22, %s1546_s30  ;;  %p1406_p3 = por %p1405_p7, %p1404_p0 }
 0x1e0   : > { %p1407_p9 = pnand %p1406_p3, %p1400_p13 }
 0x24c   : > { %v656_v25 = vpop.permute.xlu0 %655  ;;  %v668_v27 = vpop.permute.xlu1 %667 }
 0x250   : > { %v659_v26 = vpop.permute.xlu0 %658 }
 0x251   : > { %v662_v28 = vsel %vm661_vm4, %v656_v25, %v659_v26 }
 0x252   : > { %v670_v29 = vsel %vm664_vm5, %v662_v28, %v668_v27 }
 0x253   : > { %675 = vrot.lane.b32.xlu0 %v670_v29, %s1547_s13  ;;  %672 = vrot.lane.b32.xlu1 %v670_v29, %s1548_s28 }
 0x2c5   : > { %v676_v31 = vpop.permute.xlu0 %675  ;;  %v673_v32 = vpop.permute.xlu1 %672 }
 0x2c6   : > { %v679_v33 = vsel %vm678_vm6, %v673_v32, %v676_v31 }
 0x2c7   : > { %v684_v34 = vsel %vm681_vm7, %v679_v33, %v670_v29 }
 0x2c8   : > { %689 = vrot.lane.b32.xlu0 %v684_v34, %s1549_s3  ;;  %686 = vrot.lane.b32.xlu1 %v684_v34, %s1550_s8 }
 0x33a   : > { %v690_v36 = vpop.permute.xlu0 %689  ;;  %v687_v37 = vpop.permute.xlu1 %686 }
 0x33b   : > { %v693_v38 = vsel %vm692_vm8, %v687_v37, %v690_v36 }
 0x33c   : > { %v698_v39 = vsel %vm695_vm9, %v693_v38, %v684_v34 }
 0x33d   : > { %v699_v40 = vadd.f32 %v698_v39, %v645_v21 }
 0x33f   : > { %v700_v41 = vsel %vm485_vm1, %v699_v40, -inf }
 0x340   : > { %701 = vmax.xlane.f32.xlu1 %v700_v41 }
 0x3cd   : > { %v702_v42 = vpop.xlane.xlu1 %701 }
 0x3ce   : > { %v703_v43 = vsub.f32 %v699_v40, %v702_v42 }
 0x3d0   : > { %v704_v44 = vmul.f32 1.442695, %v703_v43 }
 0x3d2   : > { %1213 = vpow2.f32 %v704_v44 }
 0x3dc   : > { %v1214_v45 = vpop.eup %1213 }
 0x3dd   : > { %v706_v46 = vsel %vm485_vm1, %v1214_v45, 0.0 }
 0x3de   : > { %707 = vadd.xlane.f32.xlu0 %v706_v46 }
 0x46b   : > { %v708_v48 = vpop.xlane.xlu0 %707 }
 0x46c   : > { %1215 = vrcp.f32 %v708_v48 }
 0x476   : > { %v1216_v49 = vpop.eup %1215 }
 0x477   : > { %v710_v50 = vmul.f32 %v1216_v49, %v1214_v45 }
 0x479   : > { %1064 = vmatmul.mubr.msk.f32.vlgmr.msra.gmra.mrb[2].mxu0 %vm485_vm1, %v710_v50 }
 0x54c   : > { %v780_v51 = vpop.f32.mrb[2].mxu0 }
 0x54d   : > { %784 = vst.msk [vmem:[%s468_s12] sm:$0xff] %vm485_vm1, %v780_v51  ;;  %v1065_v52 = vpop.f32.mrb[3].mxu0 }
 0x54e   : > { %1410 = shalt.err (!%p1407_p9)
}
 0x54f   : > { %s1411_s11 = scalar_lea.hbm %s2006_s17, 128  ;;  %s1415_s28 = scalar_lea.hbm %s2157_s15, 1024 }
 0x550   : > { %p1412_p6 = scmp.ne.s32.totalorder %s2006_s17, %s1411_s11  ;;  %p1416_p8 = scmp.lt.u32.totalorder %s2006_s17, %s2157_s15 }
 0x551   : > { %p1417_p10 = scmp.lt.u32.totalorder %s1415_s28, %s1411_s11  ;;  %p1419_p1 = scmp.lt.u32.totalorder %s1411_s11, %s2006_s17 }
 0x552   : > { %p1413_p4 = pnand %p1412_p6, %p2158_p5 }
 0x553   : > { %p1418_p11 = por %p1417_p10, %p1416_p8 }
 0x554   : > { %p1414_p12 = pneg %p1413_p4 }
 0x555   : > { %p1420_p2 = por %p1419_p1, %p1418_p11 }
 0x557   : > { %p1421_p13 = pnand %p1420_p2, %p1414_p12 }
 0x559   : > { %1424 = shalt.err (!%p1421_p13)
}
 0x55a   : > { %1086 = dma.vmem_to_hbm [thread:$0]  (%p2158_p5), %s2008_s10, 128, %s2006_s17, %s786_s9  }
 0x55b PF: > { %s2159_s16 = sld [smem:[#allocation25_spill]]  ;;  %s2160_s18 = sld [smem:[#allocation21_spill]] }
 0x55c   : > { %s2161_s1 = sld [smem:[#allocation33_spill]] }
 0x561   : > { %p1112_p0 = scmp.ge.s32.totalorder %s2159_s16, 2  ;;  %s813_s14 = sand.u32 1, %s2160_s18  }
 0x562   : > { %p2162_p7 = scmp.ne.s32.totalorder %s2161_s1, 0  ;;  %s814_s27 = scalar_lea.sflag [#allocation4], %s813_s14 }
 0x564   : > { %p1108_p3 = pnand %p1112_p0, %p2162_p7 }
 0x566   : > { %1486 = dma.done.wait (!%p1108_p3), %s814_s27, 128  }
 0x567   : > { %1488 = vsyncadd (!%p1108_p3), %s814_s27, 4294967168  ;;  %s31_s7 = sadd.s32 1, %s2159_s16   ;;  %s2163_s21 = sld [smem:[#allocation19_spill]] }
 0x568   : > { %p28_p9 = scmp.ge.s32.totalorder %s31_s7, 10   ;;  %s2164_s22 = sld [smem:[#allocation20_spill]] }
 0x569   : > { %s2165_s23 = sld [smem:[#allocation29_spill]]  ;;  %s2166_s12 = sld [smem:[#allocation30_spill]] }
 0x56a   : > { %s2167_s28 = sld [smem:[#allocation24_spill]]  ;;  %s2168_s10 = sld [smem:[#allocation27_spill]] }
 0x56b   : > { %s2169_s30 = sld [smem:[#allocation28_spill]]  ;;  %s2170_s24 = smov %s1507_s25 }
 0x56c   : > { %s2171_s25 = smov %s1511_s26  ;;  %s2173_s27 = smov %s1523_s29 }
 0x56d   :  { %30 = sbr.rel (!%p28_p9) target bundleno = 19 (0x13), region = 150 }
 0x56f   : > { %s2172_s26 = smov %s2166_s12 }
 0x570   : > { %s2174_s29 = smov %s2168_s10 }
 0x574   :  { %819 = vsyncpa [#allocation3], 1 }
 0x575   :  { %821 = vsyncpa [#allocation3 + $0x1], 1 }
 0x576   :  { %822 = vsyncpa [#allocation6], 1 }
 0x577   :  { %824 = vsyncpa [#allocation6 + $0x1], 1 }
 0x578   :  { %825 = vsyncpa [#allocation9], 1 }
 0x579   :  { %827 = vsyncpa [#allocation9 + $0x1], 1 }
 0x57a   :  { %828 = vsyncpa [#allocation12], 1 }
 0x57b   :  { %830 = vsyncpa [#allocation12 + $0x1], 1 }
 0x57c   :  { %831 = vsyncpa [#allocation4], 1 }
 0x57d   :  { %833 = vsyncpa [#allocation4 + $0x1], 1 }

</bundles_post_ra>
